<compile_context>
chip_gen: v6e
topology: v6e:2x2x1
jax: 0.10.0
libtpu: 0.0.40
codegen_flags: <defaults>
</compile_context>

<pallas_src>
import jax
import jax.numpy as jnp
from jax.experimental import pallas as pl
from jax.experimental.pallas import tpu as pltpu

INPUT_SIZE = 16
HIDDEN = 32
NUM_LAYERS = 2      # the kernel hard-wires the 2-layer stack of the module
OUTPUT = 3
T = 8               # sequence length (= rows of the 2-D input x)
LANES = 128         # = 4 * HIDDEN; lane-dense gate / output width

# Slab row offsets — every segment starts on a multiple of 8 sublanes.
_R_WIH0 = 0          # (16, 128)
_R_WHH0 = 16         # (32, 128)
_R_B0 = 48           # (1, 128)  (padded to 8 rows)
_R_WIH1 = 56         # (32, 128)
_R_WHH1 = 88         # (32, 128)
_R_B1 = 120          # (1, 128)  (padded to 8 rows)
_R_WFC = 128         # (32, 128) (lanes >= OUTPUT are zero)
_R_BFC = 160         # (1, 128)  (padded to 8 rows)
SLAB_ROWS = 168


def lstm_kernel(x_ref, slab_ref, out_ref, gx0_ref, h1_ref):
    H = HIDDEN
    seq = x_ref.shape[0]          # static (== T)

    wih0 = slab_ref[_R_WIH0:_R_WIH0 + INPUT_SIZE, :]
    whh0 = slab_ref[_R_WHH0:_R_WHH0 + H, :]
    b0 = slab_ref[_R_B0:_R_B0 + 1, :]
    wih1 = slab_ref[_R_WIH1:_R_WIH1 + H, :]
    whh1 = slab_ref[_R_WHH1:_R_WHH1 + H, :]
    b1 = slab_ref[_R_B1:_R_B1 + 1, :]
    wfc = slab_ref[_R_WFC:_R_WFC + H, :]
    bfc = slab_ref[_R_BFC:_R_BFC + 1, :]

    def gates(g):
        # i/f/o columns of every weight/bias were pre-scaled by 0.5 host-side,
        # so one tanh over the full (1, 4H) vector yields tanh(z/2) on the
        # i/f/o lanes and tanh(z) on the candidate lanes; sigmoid(z) is then
        # the cheap VPU affine 0.5*tanh(z/2) + 0.5.
        th = jnp.tanh(g)
        sg = 0.5 * th + 0.5
        return (sg[:, 0:H],          # i
                sg[:, H:2 * H],      # f
                th[:, 2 * H:3 * H],  # g (candidate)
                sg[:, 3 * H:4 * H])  # o

    # Layer-0 input projection for ALL timesteps: one (T, I) @ (I, 4H) matmul,
    # independent of both recurrences.  Stash it in VMEM so per-step row
    # extraction is a plain vld instead of a sublane rotate on the serial path.
    gx0_ref[...] = jnp.dot(x_ref[...], wih0,
                           preferred_element_type=jnp.float32) + b0

    h0 = jnp.zeros((1, H), jnp.float32)
    c0 = jnp.zeros((1, H), jnp.float32)
    h1 = jnp.zeros((1, H), jnp.float32)
    c1 = jnp.zeros((1, H), jnp.float32)
    h0_hist = [None] * seq

    # Software-skewed recurrences: iteration t runs layer-0 cell t and layer-1
    # cell t-1.  The two dependency chains are independent, so the scheduler
    # overlaps their MXU pops / EUP pushes / VPU updates.
    for t in range(seq + 1):                  # fully unrolled, static indices
        if t < seq:
            g0 = gx0_ref[t:t + 1, :] + jnp.dot(
                h0, whh0, preferred_element_type=jnp.float32)
            i0, f0, gg0, o0 = gates(g0)
            c0 = f0 * c0 + i0 * gg0
            h0 = o0 * jnp.tanh(c0)
            h0_hist[t] = h0
        if t >= 1:
            hp = h0_hist[t - 1]
            g1 = (jnp.dot(hp, wih1, preferred_element_type=jnp.float32) + b1
                  + jnp.dot(h1, whh1, preferred_element_type=jnp.float32))
            i1, f1, gg1, o1 = gates(g1)
            c1 = f1 * c1 + i1 * gg1
            h1 = o1 * jnp.tanh(c1)
            h1_ref[t - 1:t, :] = h1           # vst slot, off the serial chain

    # Final fc over the full layer-1 sequence, lane-dense (T, 128) output:
    # lanes >= OUTPUT carry zero weights and are sliced off in the wrapper.
    out_ref[...] = jnp.dot(h1_ref[...], wfc,
                           preferred_element_type=jnp.float32) + bfc


def lstm_forward(x, slab):
    seq = x.shape[0]
    vmem = pl.BlockSpec(memory_space=pltpu.MemorySpace.VMEM)
    out = pl.pallas_call(
        lstm_kernel,
        out_shape=jax.ShapeDtypeStruct((seq, LANES), jnp.float32),
        in_specs=[vmem, vmem],
        out_specs=vmem,
        scratch_shapes=[pltpu.VMEM((seq, LANES), jnp.float32),   # gx0 rows
                        pltpu.VMEM((seq, HIDDEN), jnp.float32)], # h1 history
    )(x, slab)
    return out[:, :OUTPUT]


def init_params(key):
    """Deterministic init matching PyTorch LSTM/Linear parameter shapes,
    returned in kernel layout (transposed weights, fused biases)."""
    stdv = 1.0 / jnp.sqrt(HIDDEN)
    ks = jax.random.split(key, 10)
    u = lambda k, shape: jax.random.uniform(k, shape, jnp.float32, -stdv, stdv)
    # layer 0 (input_size -> hidden)
    w_ih0 = u(ks[0], (4 * HIDDEN, INPUT_SIZE))
    w_hh0 = u(ks[1], (4 * HIDDEN, HIDDEN))
    b_ih0 = u(ks[2], (4 * HIDDEN,))
    b_hh0 = u(ks[3], (4 * HIDDEN,))
    # layer 1 (hidden -> hidden)
    w_ih1 = u(ks[4], (4 * HIDDEN, HIDDEN))
    w_hh1 = u(ks[5], (4 * HIDDEN, HIDDEN))
    b_ih1 = u(ks[6], (4 * HIDDEN,))
    b_hh1 = u(ks[7], (4 * HIDDEN,))
    # fc (hidden -> output)
    w_fc = u(ks[8], (OUTPUT, HIDDEN))
    b_fc = u(ks[9], (OUTPUT,))
    return (w_ih0.T, w_hh0.T, (b_ih0 + b_hh0)[None, :],
            w_ih1.T, w_hh1.T, (b_ih1 + b_hh1)[None, :],
            w_fc.T, b_fc[None, :])


def pack_params(params):
    """Pack everything into one lane-aligned (SLAB_ROWS, 128) f32 slab.

    i/f/o gate columns are pre-scaled by 0.5 (single-tanh gate trick);
    fc weight/bias are zero-padded from OUTPUT=3 to 128 lanes (lane-dense out).
    """
    wih0, whh0, b0, wih1, whh1, b1, wfc, bfc = params
    H = HIDDEN
    scale = jnp.full((4 * H,), 0.5, jnp.float32).at[2 * H:3 * H].set(1.0)

    sc = lambda w: w * scale                                   # gate-column scale
    pad_rows = lambda a, r: jnp.pad(a, ((0, r - a.shape[0]), (0, 0)))
    pad_lanes = lambda a: jnp.pad(a, ((0, 0), (0, LANES - a.shape[1])))

    slab = jnp.concatenate([
        sc(wih0),                     # rows   0:16
        sc(whh0),                     # rows  16:48
        pad_rows(sc(b0), 8),          # rows  48:56
        sc(wih1),                     # rows  56:88
        sc(whh1),                     # rows  88:120
        pad_rows(sc(b1), 8),          # rows 120:128
        pad_lanes(wfc),               # rows 128:160
        pad_rows(pad_lanes(bfc), 8),  # rows 160:168
    ], axis=0)
    assert slab.shape == (SLAB_ROWS, LANES), slab.shape
    return slab


def reference_forward(x, params):
    """Pure-JAX reference of the PyTorch module's forward (batch=1)."""
    wih0, whh0, b0, wih1, whh1, b1, wfc, bfc = params
    H = HIDDEN
    h0 = c0 = h1 = c1 = jnp.zeros((1, H), jnp.float32)

    def split(g):
        return (jax.nn.sigmoid(g[:, 0:H]), jax.nn.sigmoid(g[:, H:2 * H]),
                jnp.tanh(g[:, 2 * H:3 * H]), jax.nn.sigmoid(g[:, 3 * H:4 * H]))

    outs = []
    for t in range(x.shape[0]):
        xt = x[t:t + 1]
        g0 = xt @ wih0 + b0 + h0 @ whh0
        i0, f0, gg0, o0 = split(g0)
        c0 = f0 * c0 + i0 * gg0
        h0 = o0 * jnp.tanh(c0)
        g1 = h0 @ wih1 + b1 + h1 @ whh1
        i1, f1, gg1, o1 = split(g1)
        c1 = f1 * c1 + i1 * gg1
        h1 = o1 * jnp.tanh(c1)
        outs.append(h1)
    hs = jnp.concatenate(outs, axis=0)
    return hs @ wfc + bfc


if __name__ == "__main__":
    key = jax.random.PRNGKey(0)
    k_params, k_x = jax.random.split(key)
    params = init_params(k_params)
    slab = jax.block_until_ready(pack_params(params))
    x = jax.random.normal(k_x, (T, INPUT_SIZE), jnp.float32)

    out = jax.block_until_ready(lstm_forward(x, slab))
    assert out.shape == (T, OUTPUT), out.shape

    ref = reference_forward(x, params)
    err = float(jnp.max(jnp.abs(out - ref)))
    assert err < 1e-4, f"mismatch vs reference: {err}"

    print("KERNEL_OK")
</pallas_src>

<mosaic_0001>
module attributes {stable_mosaic.version = 11 : i64} {
  func.func @lstm_kernel(%arg0: memref<8x16xf32, #tpu.memory_space<vmem>>, %arg1: memref<168x128xf32, #tpu.memory_space<vmem>>, %arg2: memref<8x128xf32, #tpu.memory_space<vmem>>, %arg3: memref<8x128xf32, #tpu.memory_space<vmem>>, %arg4: memref<8x32xf32, #tpu.memory_space<vmem>>) attributes {dimension_semantics = [], scalar_prefetch = 0 : i64, scratch_operands = 2 : i64, tpu.core_type = #tpu.core_type<tc>} {
    %c0 = arith.constant 0 : index
    %c0_0 = arith.constant 0 : index
    %0 = vector.load %arg1[%c0, %c0_0] : memref<168x128xf32, #tpu.memory_space<vmem>>, vector<16x128xf32>
    %c16 = arith.constant 16 : index
    %c0_1 = arith.constant 0 : index
    %1 = vector.load %arg1[%c16, %c0_1] : memref<168x128xf32, #tpu.memory_space<vmem>>, vector<32x128xf32>
    %c48 = arith.constant 48 : index
    %c0_2 = arith.constant 0 : index
    %2 = vector.load %arg1[%c48, %c0_2] : memref<168x128xf32, #tpu.memory_space<vmem>>, vector<1x128xf32>
    %c56 = arith.constant 56 : index
    %c0_3 = arith.constant 0 : index
    %3 = vector.load %arg1[%c56, %c0_3] : memref<168x128xf32, #tpu.memory_space<vmem>>, vector<32x128xf32>
    %c88 = arith.constant 88 : index
    %c0_4 = arith.constant 0 : index
    %4 = vector.load %arg1[%c88, %c0_4] : memref<168x128xf32, #tpu.memory_space<vmem>>, vector<32x128xf32>
    %c120 = arith.constant 120 : index
    %c0_5 = arith.constant 0 : index
    %5 = vector.load %arg1[%c120, %c0_5] : memref<168x128xf32, #tpu.memory_space<vmem>>, vector<1x128xf32>
    %c128 = arith.constant 128 : index
    %c0_6 = arith.constant 0 : index
    %6 = vector.load %arg1[%c128, %c0_6] : memref<168x128xf32, #tpu.memory_space<vmem>>, vector<32x128xf32>
    %c160 = arith.constant 160 : index
    %c0_7 = arith.constant 0 : index
    %7 = vector.load %arg1[%c160, %c0_7] : memref<168x128xf32, #tpu.memory_space<vmem>>, vector<1x128xf32>
    %c0_8 = arith.constant 0 : index
    %c0_9 = arith.constant 0 : index
    %8 = vector.load %arg0[%c0_8, %c0_9] : memref<8x16xf32, #tpu.memory_space<vmem>>, vector<8x16xf32>
    %cst = arith.constant dense<0.000000e+00> : vector<8x128xf32>
    %9 = tpu.matmul %8, %0, %cst {dimension_numbers = #tpu.dot_dimension_numbers<[1], [0], [0], [1], [0, 0, 1, 1], [], []>} : vector<8x16xf32>, vector<16x128xf32>, vector<8x128xf32> -> vector<8x128xf32>
    %10 = vector.broadcast %2 : vector<1x128xf32> to vector<8x128xf32>
    %11 = arith.addf %9, %10 : vector<8x128xf32>
    %c0_10 = arith.constant 0 : index
    %c0_11 = arith.constant 0 : index
    %12 = vector.load %arg3[%c0_10, %c0_11] : memref<8x128xf32, #tpu.memory_space<vmem>>, vector<8x128xf32>
    tpu.vector_store %arg3[%c0_10, %c0_11], %11 {strides = array<i32>} : memref<8x128xf32, #tpu.memory_space<vmem>>, vector<8x128xf32>,
    %cst_12 = arith.constant 0.000000e+00 : f32
    %13 = vector.broadcast %cst_12 : f32 to vector<1x32xf32>
    %cst_13 = arith.constant 0.000000e+00 : f32
    %14 = vector.broadcast %cst_13 : f32 to vector<1x32xf32>
    %cst_14 = arith.constant 0.000000e+00 : f32
    %15 = vector.broadcast %cst_14 : f32 to vector<1x32xf32>
    %cst_15 = arith.constant 0.000000e+00 : f32
    %16 = vector.broadcast %cst_15 : f32 to vector<1x32xf32>
    %c0_16 = arith.constant 0 : index
    %c0_17 = arith.constant 0 : index
    %17 = vector.load %arg3[%c0_16, %c0_17] : memref<8x128xf32, #tpu.memory_space<vmem>>, vector<1x128xf32>
    %cst_18 = arith.constant dense<0.000000e+00> : vector<1x128xf32>
    %18 = tpu.matmul %13, %1, %cst_18 {dimension_numbers = #tpu.dot_dimension_numbers<[1], [0], [0], [1], [0, 0, 1, 1], [], []>} : vector<1x32xf32>, vector<32x128xf32>, vector<1x128xf32> -> vector<1x128xf32>
    %19 = arith.addf %17, %18 : vector<1x128xf32>
    %20 = math.tanh %19 : vector<1x128xf32>
    %cst_19 = arith.constant 5.000000e-01 : f32
    %21 = vector.broadcast %cst_19 : f32 to vector<1x128xf32>
    %22 = arith.mulf %21, %20 : vector<1x128xf32>
    %cst_20 = arith.constant 5.000000e-01 : f32
    %23 = vector.broadcast %cst_20 : f32 to vector<1x128xf32>
    %24 = arith.addf %22, %23 : vector<1x128xf32>
    %25 = vector.extract_strided_slice %24 {offsets = [0, 0], sizes = [1, 32], strides = [1, 1]} : vector<1x128xf32> to vector<1x32xf32>
    %26 = vector.extract_strided_slice %24 {offsets = [0, 32], sizes = [1, 32], strides = [1, 1]} : vector<1x128xf32> to vector<1x32xf32>
    %27 = vector.extract_strided_slice %20 {offsets = [0, 64], sizes = [1, 32], strides = [1, 1]} : vector<1x128xf32> to vector<1x32xf32>
    %28 = vector.extract_strided_slice %24 {offsets = [0, 96], sizes = [1, 32], strides = [1, 1]} : vector<1x128xf32> to vector<1x32xf32>
    %29 = arith.mulf %26, %14 : vector<1x32xf32>
    %30 = arith.mulf %25, %27 : vector<1x32xf32>
    %31 = arith.addf %29, %30 : vector<1x32xf32>
    %32 = math.tanh %31 : vector<1x32xf32>
    %33 = arith.mulf %28, %32 : vector<1x32xf32>
    %c1 = arith.constant 1 : index
    %c0_21 = arith.constant 0 : index
    %34 = vector.load %arg3[%c1, %c0_21] : memref<8x128xf32, #tpu.memory_space<vmem>>, vector<1x128xf32>
    %cst_22 = arith.constant dense<0.000000e+00> : vector<1x128xf32>
    %35 = tpu.matmul %33, %1, %cst_22 {dimension_numbers = #tpu.dot_dimension_numbers<[1], [0], [0], [1], [0, 0, 1, 1], [], []>} : vector<1x32xf32>, vector<32x128xf32>, vector<1x128xf32> -> vector<1x128xf32>
    %36 = arith.addf %34, %35 : vector<1x128xf32>
    %37 = math.tanh %36 : vector<1x128xf32>
    %cst_23 = arith.constant 5.000000e-01 : f32
    %38 = vector.broadcast %cst_23 : f32 to vector<1x128xf32>
    %39 = arith.mulf %38, %37 : vector<1x128xf32>
    %cst_24 = arith.constant 5.000000e-01 : f32
    %40 = vector.broadcast %cst_24 : f32 to vector<1x128xf32>
    %41 = arith.addf %39, %40 : vector<1x128xf32>
    %42 = vector.extract_strided_slice %41 {offsets = [0, 0], sizes = [1, 32], strides = [1, 1]} : vector<1x128xf32> to vector<1x32xf32>
    %43 = vector.extract_strided_slice %41 {offsets = [0, 32], sizes = [1, 32], strides = [1, 1]} : vector<1x128xf32> to vector<1x32xf32>
    %44 = vector.extract_strided_slice %37 {offsets = [0, 64], sizes = [1, 32], strides = [1, 1]} : vector<1x128xf32> to vector<1x32xf32>
    %45 = vector.extract_strided_slice %41 {offsets = [0, 96], sizes = [1, 32], strides = [1, 1]} : vector<1x128xf32> to vector<1x32xf32>
    %46 = arith.mulf %43, %31 : vector<1x32xf32>
    %47 = arith.mulf %42, %44 : vector<1x32xf32>
    %48 = arith.addf %46, %47 : vector<1x32xf32>
    %49 = math.tanh %48 : vector<1x32xf32>
    %50 = arith.mulf %45, %49 : vector<1x32xf32>
    %cst_25 = arith.constant dense<0.000000e+00> : vector<1x128xf32>
    %51 = tpu.matmul %33, %3, %cst_25 {dimension_numbers = #tpu.dot_dimension_numbers<[1], [0], [0], [1], [0, 0, 1, 1], [], []>} : vector<1x32xf32>, vector<32x128xf32>, vector<1x128xf32> -> vector<1x128xf32>
    %52 = arith.addf %51, %5 : vector<1x128xf32>
    %cst_26 = arith.constant dense<0.000000e+00> : vector<1x128xf32>
    %53 = tpu.matmul %15, %4, %cst_26 {dimension_numbers = #tpu.dot_dimension_numbers<[1], [0], [0], [1], [0, 0, 1, 1], [], []>} : vector<1x32xf32>, vector<32x128xf32>, vector<1x128xf32> -> vector<1x128xf32>
    %54 = arith.addf %52, %53 : vector<1x128xf32>
    %55 = math.tanh %54 : vector<1x128xf32>
    %cst_27 = arith.constant 5.000000e-01 : f32
    %56 = vector.broadcast %cst_27 : f32 to vector<1x128xf32>
    %57 = arith.mulf %56, %55 : vector<1x128xf32>
    %cst_28 = arith.constant 5.000000e-01 : f32
    %58 = vector.broadcast %cst_28 : f32 to vector<1x128xf32>
    %59 = arith.addf %57, %58 : vector<1x128xf32>
    %60 = vector.extract_strided_slice %59 {offsets = [0, 0], sizes = [1, 32], strides = [1, 1]} : vector<1x128xf32> to vector<1x32xf32>
    %61 = vector.extract_strided_slice %59 {offsets = [0, 32], sizes = [1, 32], strides = [1, 1]} : vector<1x128xf32> to vector<1x32xf32>
    %62 = vector.extract_strided_slice %55 {offsets = [0, 64], sizes = [1, 32], strides = [1, 1]} : vector<1x128xf32> to vector<1x32xf32>
    %63 = vector.extract_strided_slice %59 {offsets = [0, 96], sizes = [1, 32], strides = [1, 1]} : vector<1x128xf32> to vector<1x32xf32>
    %64 = arith.mulf %61, %16 : vector<1x32xf32>
    %65 = arith.mulf %60, %62 : vector<1x32xf32>
    %66 = arith.addf %64, %65 : vector<1x32xf32>
    %67 = math.tanh %66 : vector<1x32xf32>
    %68 = arith.mulf %63, %67 : vector<1x32xf32>
    %c0_29 = arith.constant 0 : index
    %c0_30 = arith.constant 0 : index
    %69 = vector.load %arg4[%c0_29, %c0_30] : memref<8x32xf32, #tpu.memory_space<vmem>>, vector<1x32xf32>
    tpu.vector_store %arg4[%c0_29, %c0_30], %68 {strides = array<i32>} : memref<8x32xf32, #tpu.memory_space<vmem>>, vector<1x32xf32>,
    %c2 = arith.constant 2 : index
    %c0_31 = arith.constant 0 : index
    %70 = vector.load %arg3[%c2, %c0_31] : memref<8x128xf32, #tpu.memory_space<vmem>>, vector<1x128xf32>
    %cst_32 = arith.constant dense<0.000000e+00> : vector<1x128xf32>
    %71 = tpu.matmul %50, %1, %cst_32 {dimension_numbers = #tpu.dot_dimension_numbers<[1], [0], [0], [1], [0, 0, 1, 1], [], []>} : vector<1x32xf32>, vector<32x128xf32>, vector<1x128xf32> -> vector<1x128xf32>
    %72 = arith.addf %70, %71 : vector<1x128xf32>
    %73 = math.tanh %72 : vector<1x128xf32>
    %cst_33 = arith.constant 5.000000e-01 : f32
    %74 = vector.broadcast %cst_33 : f32 to vector<1x128xf32>
    %75 = arith.mulf %74, %73 : vector<1x128xf32>
    %cst_34 = arith.constant 5.000000e-01 : f32
    %76 = vector.broadcast %cst_34 : f32 to vector<1x128xf32>
    %77 = arith.addf %75, %76 : vector<1x128xf32>
    %78 = vector.extract_strided_slice %77 {offsets = [0, 0], sizes = [1, 32], strides = [1, 1]} : vector<1x128xf32> to vector<1x32xf32>
    %79 = vector.extract_strided_slice %77 {offsets = [0, 32], sizes = [1, 32], strides = [1, 1]} : vector<1x128xf32> to vector<1x32xf32>
    %80 = vector.extract_strided_slice %73 {offsets = [0, 64], sizes = [1, 32], strides = [1, 1]} : vector<1x128xf32> to vector<1x32xf32>
    %81 = vector.extract_strided_slice %77 {offsets = [0, 96], sizes = [1, 32], strides = [1, 1]} : vector<1x128xf32> to vector<1x32xf32>
    %82 = arith.mulf %79, %48 : vector<1x32xf32>
    %83 = arith.mulf %78, %80 : vector<1x32xf32>
    %84 = arith.addf %82, %83 : vector<1x32xf32>
    %85 = math.tanh %84 : vector<1x32xf32>
    %86 = arith.mulf %81, %85 : vector<1x32xf32>
    %cst_35 = arith.constant dense<0.000000e+00> : vector<1x128xf32>
    %87 = tpu.matmul %50, %3, %cst_35 {dimension_numbers = #tpu.dot_dimension_numbers<[1], [0], [0], [1], [0, 0, 1, 1], [], []>} : vector<1x32xf32>, vector<32x128xf32>, vector<1x128xf32> -> vector<1x128xf32>
    %88 = arith.addf %87, %5 : vector<1x128xf32>
    %cst_36 = arith.constant dense<0.000000e+00> : vector<1x128xf32>
    %89 = tpu.matmul %68, %4, %cst_36 {dimension_numbers = #tpu.dot_dimension_numbers<[1], [0], [0], [1], [0, 0, 1, 1], [], []>} : vector<1x32xf32>, vector<32x128xf32>, vector<1x128xf32> -> vector<1x128xf32>
    %90 = arith.addf %88, %89 : vector<1x128xf32>
    %91 = math.tanh %90 : vector<1x128xf32>
    %cst_37 = arith.constant 5.000000e-01 : f32
    %92 = vector.broadcast %cst_37 : f32 to vector<1x128xf32>
    %93 = arith.mulf %92, %91 : vector<1x128xf32>
    %cst_38 = arith.constant 5.000000e-01 : f32
    %94 = vector.broadcast %cst_38 : f32 to vector<1x128xf32>
    %95 = arith.addf %93, %94 : vector<1x128xf32>
    %96 = vector.extract_strided_slice %95 {offsets = [0, 0], sizes = [1, 32], strides = [1, 1]} : vector<1x128xf32> to vector<1x32xf32>
    %97 = vector.extract_strided_slice %95 {offsets = [0, 32], sizes = [1, 32], strides = [1, 1]} : vector<1x128xf32> to vector<1x32xf32>
    %98 = vector.extract_strided_slice %91 {offsets = [0, 64], sizes = [1, 32], strides = [1, 1]} : vector<1x128xf32> to vector<1x32xf32>
    %99 = vector.extract_strided_slice %95 {offsets = [0, 96], sizes = [1, 32], strides = [1, 1]} : vector<1x128xf32> to vector<1x32xf32>
    %100 = arith.mulf %97, %66 : vector<1x32xf32>
    %101 = arith.mulf %96, %98 : vector<1x32xf32>
    %102 = arith.addf %100, %101 : vector<1x32xf32>
    %103 = math.tanh %102 : vector<1x32xf32>
    %104 = arith.mulf %99, %103 : vector<1x32xf32>
    %c1_39 = arith.constant 1 : index
    %c0_40 = arith.constant 0 : index
    %105 = vector.load %arg4[%c1_39, %c0_40] : memref<8x32xf32, #tpu.memory_space<vmem>>, vector<1x32xf32>
    tpu.vector_store %arg4[%c1_39, %c0_40], %104 {strides = array<i32>} : memref<8x32xf32, #tpu.memory_space<vmem>>, vector<1x32xf32>,
    %c3 = arith.constant 3 : index
    %c0_41 = arith.constant 0 : index
    %106 = vector.load %arg3[%c3, %c0_41] : memref<8x128xf32, #tpu.memory_space<vmem>>, vector<1x128xf32>
    %cst_42 = arith.constant dense<0.000000e+00> : vector<1x128xf32>
    %107 = tpu.matmul %86, %1, %cst_42 {dimension_numbers = #tpu.dot_dimension_numbers<[1], [0], [0], [1], [0, 0, 1, 1], [], []>} : vector<1x32xf32>, vector<32x128xf32>, vector<1x128xf32> -> vector<1x128xf32>
    %108 = arith.addf %106, %107 : vector<1x128xf32>
    %109 = math.tanh %108 : vector<1x128xf32>
    %cst_43 = arith.constant 5.000000e-01 : f32
    %110 = vector.broadcast %cst_43 : f32 to vector<1x128xf32>
    %111 = arith.mulf %110, %109 : vector<1x128xf32>
    %cst_44 = arith.constant 5.000000e-01 : f32
    %112 = vector.broadcast %cst_44 : f32 to vector<1x128xf32>
    %113 = arith.addf %111, %112 : vector<1x128xf32>
    %114 = vector.extract_strided_slice %113 {offsets = [0, 0], sizes = [1, 32], strides = [1, 1]} : vector<1x128xf32> to vector<1x32xf32>
    %115 = vector.extract_strided_slice %113 {offsets = [0, 32], sizes = [1, 32], strides = [1, 1]} : vector<1x128xf32> to vector<1x32xf32>
    %116 = vector.extract_strided_slice %109 {offsets = [0, 64], sizes = [1, 32], strides = [1, 1]} : vector<1x128xf32> to vector<1x32xf32>
    %117 = vector.extract_strided_slice %113 {offsets = [0, 96], sizes = [1, 32], strides = [1, 1]} : vector<1x128xf32> to vector<1x32xf32>
    %118 = arith.mulf %115, %84 : vector<1x32xf32>
    %119 = arith.mulf %114, %116 : vector<1x32xf32>
    %120 = arith.addf %118, %119 : vector<1x32xf32>
    %121 = math.tanh %120 : vector<1x32xf32>
    %122 = arith.mulf %117, %121 : vector<1x32xf32>
    %cst_45 = arith.constant dense<0.000000e+00> : vector<1x128xf32>
    %123 = tpu.matmul %86, %3, %cst_45 {dimension_numbers = #tpu.dot_dimension_numbers<[1], [0], [0], [1], [0, 0, 1, 1], [], []>} : vector<1x32xf32>, vector<32x128xf32>, vector<1x128xf32> -> vector<1x128xf32>
    %124 = arith.addf %123, %5 : vector<1x128xf32>
    %cst_46 = arith.constant dense<0.000000e+00> : vector<1x128xf32>
    %125 = tpu.matmul %104, %4, %cst_46 {dimension_numbers = #tpu.dot_dimension_numbers<[1], [0], [0], [1], [0, 0, 1, 1], [], []>} : vector<1x32xf32>, vector<32x128xf32>, vector<1x128xf32> -> vector<1x128xf32>
    %126 = arith.addf %124, %125 : vector<1x128xf32>
    %127 = math.tanh %126 : vector<1x128xf32>
    %cst_47 = arith.constant 5.000000e-01 : f32
    %128 = vector.broadcast %cst_47 : f32 to vector<1x128xf32>
    %129 = arith.mulf %128, %127 : vector<1x128xf32>
    %cst_48 = arith.constant 5.000000e-01 : f32
    %130 = vector.broadcast %cst_48 : f32 to vector<1x128xf32>
    %131 = arith.addf %129, %130 : vector<1x128xf32>
    %132 = vector.extract_strided_slice %131 {offsets = [0, 0], sizes = [1, 32], strides = [1, 1]} : vector<1x128xf32> to vector<1x32xf32>
    %133 = vector.extract_strided_slice %131 {offsets = [0, 32], sizes = [1, 32], strides = [1, 1]} : vector<1x128xf32> to vector<1x32xf32>
    %134 = vector.extract_strided_slice %127 {offsets = [0, 64], sizes = [1, 32], strides = [1, 1]} : vector<1x128xf32> to vector<1x32xf32>
    %135 = vector.extract_strided_slice %131 {offsets = [0, 96], sizes = [1, 32], strides = [1, 1]} : vector<1x128xf32> to vector<1x32xf32>
    %136 = arith.mulf %133, %102 : vector<1x32xf32>
    %137 = arith.mulf %132, %134 : vector<1x32xf32>
    %138 = arith.addf %136, %137 : vector<1x32xf32>
    %139 = math.tanh %138 : vector<1x32xf32>
    %140 = arith.mulf %135, %139 : vector<1x32xf32>
    %c2_49 = arith.constant 2 : index
    %c0_50 = arith.constant 0 : index
    %141 = vector.load %arg4[%c2_49, %c0_50] : memref<8x32xf32, #tpu.memory_space<vmem>>, vector<1x32xf32>
    tpu.vector_store %arg4[%c2_49, %c0_50], %140 {strides = array<i32>} : memref<8x32xf32, #tpu.memory_space<vmem>>, vector<1x32xf32>,
    %c4 = arith.constant 4 : index
    %c0_51 = arith.constant 0 : index
    %142 = vector.load %arg3[%c4, %c0_51] : memref<8x128xf32, #tpu.memory_space<vmem>>, vector<1x128xf32>
    %cst_52 = arith.constant dense<0.000000e+00> : vector<1x128xf32>
    %143 = tpu.matmul %122, %1, %cst_52 {dimension_numbers = #tpu.dot_dimension_numbers<[1], [0], [0], [1], [0, 0, 1, 1], [], []>} : vector<1x32xf32>, vector<32x128xf32>, vector<1x128xf32> -> vector<1x128xf32>
    %144 = arith.addf %142, %143 : vector<1x128xf32>
    %145 = math.tanh %144 : vector<1x128xf32>
    %cst_53 = arith.constant 5.000000e-01 : f32
    %146 = vector.broadcast %cst_53 : f32 to vector<1x128xf32>
    %147 = arith.mulf %146, %145 : vector<1x128xf32>
    %cst_54 = arith.constant 5.000000e-01 : f32
    %148 = vector.broadcast %cst_54 : f32 to vector<1x128xf32>
    %149 = arith.addf %147, %148 : vector<1x128xf32>
    %150 = vector.extract_strided_slice %149 {offsets = [0, 0], sizes = [1, 32], strides = [1, 1]} : vector<1x128xf32> to vector<1x32xf32>
    %151 = vector.extract_strided_slice %149 {offsets = [0, 32], sizes = [1, 32], strides = [1, 1]} : vector<1x128xf32> to vector<1x32xf32>
    %152 = vector.extract_strided_slice %145 {offsets = [0, 64], sizes = [1, 32], strides = [1, 1]} : vector<1x128xf32> to vector<1x32xf32>
    %153 = vector.extract_strided_slice %149 {offsets = [0, 96], sizes = [1, 32], strides = [1, 1]} : vector<1x128xf32> to vector<1x32xf32>
    %154 = arith.mulf %151, %120 : vector<1x32xf32>
    %155 = arith.mulf %150, %152 : vector<1x32xf32>
    %156 = arith.addf %154, %155 : vector<1x32xf32>
    %157 = math.tanh %156 : vector<1x32xf32>
    %158 = arith.mulf %153, %157 : vector<1x32xf32>
    %cst_55 = arith.constant dense<0.000000e+00> : vector<1x128xf32>
    %159 = tpu.matmul %122, %3, %cst_55 {dimension_numbers = #tpu.dot_dimension_numbers<[1], [0], [0], [1], [0, 0, 1, 1], [], []>} : vector<1x32xf32>, vector<32x128xf32>, vector<1x128xf32> -> vector<1x128xf32>
    %160 = arith.addf %159, %5 : vector<1x128xf32>
    %cst_56 = arith.constant dense<0.000000e+00> : vector<1x128xf32>
    %161 = tpu.matmul %140, %4, %cst_56 {dimension_numbers = #tpu.dot_dimension_numbers<[1], [0], [0], [1], [0, 0, 1, 1], [], []>} : vector<1x32xf32>, vector<32x128xf32>, vector<1x128xf32> -> vector<1x128xf32>
    %162 = arith.addf %160, %161 : vector<1x128xf32>
    %163 = math.tanh %162 : vector<1x128xf32>
    %cst_57 = arith.constant 5.000000e-01 : f32
    %164 = vector.broadcast %cst_57 : f32 to vector<1x128xf32>
    %165 = arith.mulf %164, %163 : vector<1x128xf32>
    %cst_58 = arith.constant 5.000000e-01 : f32
    %166 = vector.broadcast %cst_58 : f32 to vector<1x128xf32>
    %167 = arith.addf %165, %166 : vector<1x128xf32>
    %168 = vector.extract_strided_slice %167 {offsets = [0, 0], sizes = [1, 32], strides = [1, 1]} : vector<1x128xf32> to vector<1x32xf32>
    %169 = vector.extract_strided_slice %167 {offsets = [0, 32], sizes = [1, 32], strides = [1, 1]} : vector<1x128xf32> to vector<1x32xf32>
    %170 = vector.extract_strided_slice %163 {offsets = [0, 64], sizes = [1, 32], strides = [1, 1]} : vector<1x128xf32> to vector<1x32xf32>
    %171 = vector.extract_strided_slice %167 {offsets = [0, 96], sizes = [1, 32], strides = [1, 1]} : vector<1x128xf32> to vector<1x32xf32>
    %172 = arith.mulf %169, %138 : vector<1x32xf32>
    %173 = arith.mulf %168, %170 : vector<1x32xf32>
    %174 = arith.addf %172, %173 : vector<1x32xf32>
    %175 = math.tanh %174 : vector<1x32xf32>
    %176 = arith.mulf %171, %175 : vector<1x32xf32>
    %c3_59 = arith.constant 3 : index
    %c0_60 = arith.constant 0 : index
    %177 = vector.load %arg4[%c3_59, %c0_60] : memref<8x32xf32, #tpu.memory_space<vmem>>, vector<1x32xf32>
    tpu.vector_store %arg4[%c3_59, %c0_60], %176 {strides = array<i32>} : memref<8x32xf32, #tpu.memory_space<vmem>>, vector<1x32xf32>,
    %c5 = arith.constant 5 : index
    %c0_61 = arith.constant 0 : index
    %178 = vector.load %arg3[%c5, %c0_61] : memref<8x128xf32, #tpu.memory_space<vmem>>, vector<1x128xf32>
    %cst_62 = arith.constant dense<0.000000e+00> : vector<1x128xf32>
    %179 = tpu.matmul %158, %1, %cst_62 {dimension_numbers = #tpu.dot_dimension_numbers<[1], [0], [0], [1], [0, 0, 1, 1], [], []>} : vector<1x32xf32>, vector<32x128xf32>, vector<1x128xf32> -> vector<1x128xf32>
    %180 = arith.addf %178, %179 : vector<1x128xf32>
    %181 = math.tanh %180 : vector<1x128xf32>
    %cst_63 = arith.constant 5.000000e-01 : f32
    %182 = vector.broadcast %cst_63 : f32 to vector<1x128xf32>
    %183 = arith.mulf %182, %181 : vector<1x128xf32>
    %cst_64 = arith.constant 5.000000e-01 : f32
    %184 = vector.broadcast %cst_64 : f32 to vector<1x128xf32>
    %185 = arith.addf %183, %184 : vector<1x128xf32>
    %186 = vector.extract_strided_slice %185 {offsets = [0, 0], sizes = [1, 32], strides = [1, 1]} : vector<1x128xf32> to vector<1x32xf32>
    %187 = vector.extract_strided_slice %185 {offsets = [0, 32], sizes = [1, 32], strides = [1, 1]} : vector<1x128xf32> to vector<1x32xf32>
    %188 = vector.extract_strided_slice %181 {offsets = [0, 64], sizes = [1, 32], strides = [1, 1]} : vector<1x128xf32> to vector<1x32xf32>
    %189 = vector.extract_strided_slice %185 {offsets = [0, 96], sizes = [1, 32], strides = [1, 1]} : vector<1x128xf32> to vector<1x32xf32>
    %190 = arith.mulf %187, %156 : vector<1x32xf32>
    %191 = arith.mulf %186, %188 : vector<1x32xf32>
    %192 = arith.addf %190, %191 : vector<1x32xf32>
    %193 = math.tanh %192 : vector<1x32xf32>
    %194 = arith.mulf %189, %193 : vector<1x32xf32>
    %cst_65 = arith.constant dense<0.000000e+00> : vector<1x128xf32>
    %195 = tpu.matmul %158, %3, %cst_65 {dimension_numbers = #tpu.dot_dimension_numbers<[1], [0], [0], [1], [0, 0, 1, 1], [], []>} : vector<1x32xf32>, vector<32x128xf32>, vector<1x128xf32> -> vector<1x128xf32>
    %196 = arith.addf %195, %5 : vector<1x128xf32>
    %cst_66 = arith.constant dense<0.000000e+00> : vector<1x128xf32>
    %197 = tpu.matmul %176, %4, %cst_66 {dimension_numbers = #tpu.dot_dimension_numbers<[1], [0], [0], [1], [0, 0, 1, 1], [], []>} : vector<1x32xf32>, vector<32x128xf32>, vector<1x128xf32> -> vector<1x128xf32>
    %198 = arith.addf %196, %197 : vector<1x128xf32>
    %199 = math.tanh %198 : vector<1x128xf32>
    %cst_67 = arith.constant 5.000000e-01 : f32
    %200 = vector.broadcast %cst_67 : f32 to vector<1x128xf32>
    %201 = arith.mulf %200, %199 : vector<1x128xf32>
    %cst_68 = arith.constant 5.000000e-01 : f32
    %202 = vector.broadcast %cst_68 : f32 to vector<1x128xf32>
    %203 = arith.addf %201, %202 : vector<1x128xf32>
    %204 = vector.extract_strided_slice %203 {offsets = [0, 0], sizes = [1, 32], strides = [1, 1]} : vector<1x128xf32> to vector<1x32xf32>
    %205 = vector.extract_strided_slice %203 {offsets = [0, 32], sizes = [1, 32], strides = [1, 1]} : vector<1x128xf32> to vector<1x32xf32>
    %206 = vector.extract_strided_slice %199 {offsets = [0, 64], sizes = [1, 32], strides = [1, 1]} : vector<1x128xf32> to vector<1x32xf32>
    %207 = vector.extract_strided_slice %203 {offsets = [0, 96], sizes = [1, 32], strides = [1, 1]} : vector<1x128xf32> to vector<1x32xf32>
    %208 = arith.mulf %205, %174 : vector<1x32xf32>
    %209 = arith.mulf %204, %206 : vector<1x32xf32>
    %210 = arith.addf %208, %209 : vector<1x32xf32>
    %211 = math.tanh %210 : vector<1x32xf32>
    %212 = arith.mulf %207, %211 : vector<1x32xf32>
    %c4_69 = arith.constant 4 : index
    %c0_70 = arith.constant 0 : index
    %213 = vector.load %arg4[%c4_69, %c0_70] : memref<8x32xf32, #tpu.memory_space<vmem>>, vector<1x32xf32>
    tpu.vector_store %arg4[%c4_69, %c0_70], %212 {strides = array<i32>} : memref<8x32xf32, #tpu.memory_space<vmem>>, vector<1x32xf32>,
    %c6 = arith.constant 6 : index
    %c0_71 = arith.constant 0 : index
    %214 = vector.load %arg3[%c6, %c0_71] : memref<8x128xf32, #tpu.memory_space<vmem>>, vector<1x128xf32>
    %cst_72 = arith.constant dense<0.000000e+00> : vector<1x128xf32>
    %215 = tpu.matmul %194, %1, %cst_72 {dimension_numbers = #tpu.dot_dimension_numbers<[1], [0], [0], [1], [0, 0, 1, 1], [], []>} : vector<1x32xf32>, vector<32x128xf32>, vector<1x128xf32> -> vector<1x128xf32>
    %216 = arith.addf %214, %215 : vector<1x128xf32>
    %217 = math.tanh %216 : vector<1x128xf32>
    %cst_73 = arith.constant 5.000000e-01 : f32
    %218 = vector.broadcast %cst_73 : f32 to vector<1x128xf32>
    %219 = arith.mulf %218, %217 : vector<1x128xf32>
    %cst_74 = arith.constant 5.000000e-01 : f32
    %220 = vector.broadcast %cst_74 : f32 to vector<1x128xf32>
    %221 = arith.addf %219, %220 : vector<1x128xf32>
    %222 = vector.extract_strided_slice %221 {offsets = [0, 0], sizes = [1, 32], strides = [1, 1]} : vector<1x128xf32> to vector<1x32xf32>
    %223 = vector.extract_strided_slice %221 {offsets = [0, 32], sizes = [1, 32], strides = [1, 1]} : vector<1x128xf32> to vector<1x32xf32>
    %224 = vector.extract_strided_slice %217 {offsets = [0, 64], sizes = [1, 32], strides = [1, 1]} : vector<1x128xf32> to vector<1x32xf32>
    %225 = vector.extract_strided_slice %221 {offsets = [0, 96], sizes = [1, 32], strides = [1, 1]} : vector<1x128xf32> to vector<1x32xf32>
    %226 = arith.mulf %223, %192 : vector<1x32xf32>
    %227 = arith.mulf %222, %224 : vector<1x32xf32>
    %228 = arith.addf %226, %227 : vector<1x32xf32>
    %229 = math.tanh %228 : vector<1x32xf32>
    %230 = arith.mulf %225, %229 : vector<1x32xf32>
    %cst_75 = arith.constant dense<0.000000e+00> : vector<1x128xf32>
    %231 = tpu.matmul %194, %3, %cst_75 {dimension_numbers = #tpu.dot_dimension_numbers<[1], [0], [0], [1], [0, 0, 1, 1], [], []>} : vector<1x32xf32>, vector<32x128xf32>, vector<1x128xf32> -> vector<1x128xf32>
    %232 = arith.addf %231, %5 : vector<1x128xf32>
    %cst_76 = arith.constant dense<0.000000e+00> : vector<1x128xf32>
    %233 = tpu.matmul %212, %4, %cst_76 {dimension_numbers = #tpu.dot_dimension_numbers<[1], [0], [0], [1], [0, 0, 1, 1], [], []>} : vector<1x32xf32>, vector<32x128xf32>, vector<1x128xf32> -> vector<1x128xf32>
    %234 = arith.addf %232, %233 : vector<1x128xf32>
    %235 = math.tanh %234 : vector<1x128xf32>
    %cst_77 = arith.constant 5.000000e-01 : f32
    %236 = vector.broadcast %cst_77 : f32 to vector<1x128xf32>
    %237 = arith.mulf %236, %235 : vector<1x128xf32>
    %cst_78 = arith.constant 5.000000e-01 : f32
    %238 = vector.broadcast %cst_78 : f32 to vector<1x128xf32>
    %239 = arith.addf %237, %238 : vector<1x128xf32>
    %240 = vector.extract_strided_slice %239 {offsets = [0, 0], sizes = [1, 32], strides = [1, 1]} : vector<1x128xf32> to vector<1x32xf32>
    %241 = vector.extract_strided_slice %239 {offsets = [0, 32], sizes = [1, 32], strides = [1, 1]} : vector<1x128xf32> to vector<1x32xf32>
    %242 = vector.extract_strided_slice %235 {offsets = [0, 64], sizes = [1, 32], strides = [1, 1]} : vector<1x128xf32> to vector<1x32xf32>
    %243 = vector.extract_strided_slice %239 {offsets = [0, 96], sizes = [1, 32], strides = [1, 1]} : vector<1x128xf32> to vector<1x32xf32>
    %244 = arith.mulf %241, %210 : vector<1x32xf32>
    %245 = arith.mulf %240, %242 : vector<1x32xf32>
    %246 = arith.addf %244, %245 : vector<1x32xf32>
    %247 = math.tanh %246 : vector<1x32xf32>
    %248 = arith.mulf %243, %247 : vector<1x32xf32>
    %c5_79 = arith.constant 5 : index
    %c0_80 = arith.constant 0 : index
    %249 = vector.load %arg4[%c5_79, %c0_80] : memref<8x32xf32, #tpu.memory_space<vmem>>, vector<1x32xf32>
    tpu.vector_store %arg4[%c5_79, %c0_80], %248 {strides = array<i32>} : memref<8x32xf32, #tpu.memory_space<vmem>>, vector<1x32xf32>,
    %c7 = arith.constant 7 : index
    %c0_81 = arith.constant 0 : index
    %250 = vector.load %arg3[%c7, %c0_81] : memref<8x128xf32, #tpu.memory_space<vmem>>, vector<1x128xf32>
    %cst_82 = arith.constant dense<0.000000e+00> : vector<1x128xf32>
    %251 = tpu.matmul %230, %1, %cst_82 {dimension_numbers = #tpu.dot_dimension_numbers<[1], [0], [0], [1], [0, 0, 1, 1], [], []>} : vector<1x32xf32>, vector<32x128xf32>, vector<1x128xf32> -> vector<1x128xf32>
    %252 = arith.addf %250, %251 : vector<1x128xf32>
    %253 = math.tanh %252 : vector<1x128xf32>
    %cst_83 = arith.constant 5.000000e-01 : f32
    %254 = vector.broadcast %cst_83 : f32 to vector<1x128xf32>
    %255 = arith.mulf %254, %253 : vector<1x128xf32>
    %cst_84 = arith.constant 5.000000e-01 : f32
    %256 = vector.broadcast %cst_84 : f32 to vector<1x128xf32>
    %257 = arith.addf %255, %256 : vector<1x128xf32>
    %258 = vector.extract_strided_slice %257 {offsets = [0, 0], sizes = [1, 32], strides = [1, 1]} : vector<1x128xf32> to vector<1x32xf32>
    %259 = vector.extract_strided_slice %257 {offsets = [0, 32], sizes = [1, 32], strides = [1, 1]} : vector<1x128xf32> to vector<1x32xf32>
    %260 = vector.extract_strided_slice %253 {offsets = [0, 64], sizes = [1, 32], strides = [1, 1]} : vector<1x128xf32> to vector<1x32xf32>
    %261 = vector.extract_strided_slice %257 {offsets = [0, 96], sizes = [1, 32], strides = [1, 1]} : vector<1x128xf32> to vector<1x32xf32>
    %262 = arith.mulf %259, %228 : vector<1x32xf32>
    %263 = arith.mulf %258, %260 : vector<1x32xf32>
    %264 = arith.addf %262, %263 : vector<1x32xf32>
    %265 = math.tanh %264 : vector<1x32xf32>
    %266 = arith.mulf %261, %265 : vector<1x32xf32>
    %cst_85 = arith.constant dense<0.000000e+00> : vector<1x128xf32>
    %267 = tpu.matmul %230, %3, %cst_85 {dimension_numbers = #tpu.dot_dimension_numbers<[1], [0], [0], [1], [0, 0, 1, 1], [], []>} : vector<1x32xf32>, vector<32x128xf32>, vector<1x128xf32> -> vector<1x128xf32>
    %268 = arith.addf %267, %5 : vector<1x128xf32>
    %cst_86 = arith.constant dense<0.000000e+00> : vector<1x128xf32>
    %269 = tpu.matmul %248, %4, %cst_86 {dimension_numbers = #tpu.dot_dimension_numbers<[1], [0], [0], [1], [0, 0, 1, 1], [], []>} : vector<1x32xf32>, vector<32x128xf32>, vector<1x128xf32> -> vector<1x128xf32>
    %270 = arith.addf %268, %269 : vector<1x128xf32>
    %271 = math.tanh %270 : vector<1x128xf32>
    %cst_87 = arith.constant 5.000000e-01 : f32
    %272 = vector.broadcast %cst_87 : f32 to vector<1x128xf32>
    %273 = arith.mulf %272, %271 : vector<1x128xf32>
    %cst_88 = arith.constant 5.000000e-01 : f32
    %274 = vector.broadcast %cst_88 : f32 to vector<1x128xf32>
    %275 = arith.addf %273, %274 : vector<1x128xf32>
    %276 = vector.extract_strided_slice %275 {offsets = [0, 0], sizes = [1, 32], strides = [1, 1]} : vector<1x128xf32> to vector<1x32xf32>
    %277 = vector.extract_strided_slice %275 {offsets = [0, 32], sizes = [1, 32], strides = [1, 1]} : vector<1x128xf32> to vector<1x32xf32>
    %278 = vector.extract_strided_slice %271 {offsets = [0, 64], sizes = [1, 32], strides = [1, 1]} : vector<1x128xf32> to vector<1x32xf32>
    %279 = vector.extract_strided_slice %275 {offsets = [0, 96], sizes = [1, 32], strides = [1, 1]} : vector<1x128xf32> to vector<1x32xf32>
    %280 = arith.mulf %277, %246 : vector<1x32xf32>
    %281 = arith.mulf %276, %278 : vector<1x32xf32>
    %282 = arith.addf %280, %281 : vector<1x32xf32>
    %283 = math.tanh %282 : vector<1x32xf32>
    %284 = arith.mulf %279, %283 : vector<1x32xf32>
    %c6_89 = arith.constant 6 : index
    %c0_90 = arith.constant 0 : index
    %285 = vector.load %arg4[%c6_89, %c0_90] : memref<8x32xf32, #tpu.memory_space<vmem>>, vector<1x32xf32>
    tpu.vector_store %arg4[%c6_89, %c0_90], %284 {strides = array<i32>} : memref<8x32xf32, #tpu.memory_space<vmem>>, vector<1x32xf32>,
    %cst_91 = arith.constant dense<0.000000e+00> : vector<1x128xf32>
    %286 = tpu.matmul %266, %3, %cst_91 {dimension_numbers = #tpu.dot_dimension_numbers<[1], [0], [0], [1], [0, 0, 1, 1], [], []>} : vector<1x32xf32>, vector<32x128xf32>, vector<1x128xf32> -> vector<1x128xf32>
    %287 = arith.addf %286, %5 : vector<1x128xf32>
    %cst_92 = arith.constant dense<0.000000e+00> : vector<1x128xf32>
    %288 = tpu.matmul %284, %4, %cst_92 {dimension_numbers = #tpu.dot_dimension_numbers<[1], [0], [0], [1], [0, 0, 1, 1], [], []>} : vector<1x32xf32>, vector<32x128xf32>, vector<1x128xf32> -> vector<1x128xf32>
    %289 = arith.addf %287, %288 : vector<1x128xf32>
    %290 = math.tanh %289 : vector<1x128xf32>
    %cst_93 = arith.constant 5.000000e-01 : f32
    %291 = vector.broadcast %cst_93 : f32 to vector<1x128xf32>
    %292 = arith.mulf %291, %290 : vector<1x128xf32>
    %cst_94 = arith.constant 5.000000e-01 : f32
    %293 = vector.broadcast %cst_94 : f32 to vector<1x128xf32>
    %294 = arith.addf %292, %293 : vector<1x128xf32>
    %295 = vector.extract_strided_slice %294 {offsets = [0, 0], sizes = [1, 32], strides = [1, 1]} : vector<1x128xf32> to vector<1x32xf32>
    %296 = vector.extract_strided_slice %294 {offsets = [0, 32], sizes = [1, 32], strides = [1, 1]} : vector<1x128xf32> to vector<1x32xf32>
    %297 = vector.extract_strided_slice %290 {offsets = [0, 64], sizes = [1, 32], strides = [1, 1]} : vector<1x128xf32> to vector<1x32xf32>
    %298 = vector.extract_strided_slice %294 {offsets = [0, 96], sizes = [1, 32], strides = [1, 1]} : vector<1x128xf32> to vector<1x32xf32>
    %299 = arith.mulf %296, %282 : vector<1x32xf32>
    %300 = arith.mulf %295, %297 : vector<1x32xf32>
    %301 = arith.addf %299, %300 : vector<1x32xf32>
    %302 = math.tanh %301 : vector<1x32xf32>
    %303 = arith.mulf %298, %302 : vector<1x32xf32>
    %c7_95 = arith.constant 7 : index
    %c0_96 = arith.constant 0 : index
    %304 = vector.load %arg4[%c7_95, %c0_96] : memref<8x32xf32, #tpu.memory_space<vmem>>, vector<1x32xf32>
    tpu.vector_store %arg4[%c7_95, %c0_96], %303 {strides = array<i32>} : memref<8x32xf32, #tpu.memory_space<vmem>>, vector<1x32xf32>,
    %c0_97 = arith.constant 0 : index
    %c0_98 = arith.constant 0 : index
    %305 = vector.load %arg4[%c0_97, %c0_98] : memref<8x32xf32, #tpu.memory_space<vmem>>, vector<8x32xf32>
    %cst_99 = arith.constant dense<0.000000e+00> : vector<8x128xf32>
    %306 = tpu.matmul %305, %6, %cst_99 {dimension_numbers = #tpu.dot_dimension_numbers<[1], [0], [0], [1], [0, 0, 1, 1], [], []>} : vector<8x32xf32>, vector<32x128xf32>, vector<8x128xf32> -> vector<8x128xf32>
    %307 = vector.broadcast %7 : vector<1x128xf32> to vector<8x128xf32>
    %308 = arith.addf %306, %307 : vector<8x128xf32>
    %c0_100 = arith.constant 0 : index
    %c0_101 = arith.constant 0 : index
    %309 = vector.load %arg2[%c0_100, %c0_101] : memref<8x128xf32, #tpu.memory_space<vmem>>, vector<8x128xf32>
    tpu.vector_store %arg2[%c0_100, %c0_101], %308 {strides = array<i32>} : memref<8x128xf32, #tpu.memory_space<vmem>>, vector<8x128xf32>,
    return
  }
}

</mosaic_0001>

<bundles_post_ra>
// kernel: tpu_custom_call.1
= control target key start
LH: loop header
LB: loop body
LE: loop exit
PB: predicated region body
PF: predicated region fallthrough
CT: control target
= control target key end

     0   :  { %7 = vsyncpa [#allocation5], 0  ;;  %s3398_s0 = inlined_call_operand.hbm [shape: f32[8,16], index: 0, kind: input, shape index: {}]   ;;  %s3399_s1 = inlined_call_operand.hbm [shape: f32[168,128], index: 1, kind: input, shape index: {}]   ;;  %s3400_s2 = inlined_call_operand.hbm [shape: f32[8,128], index: 2, kind: output, shape index: {}]  }
   0x1   :  { %8 = vsyncpa [#allocation8], 0 }
   0x2   :  { %9 = vsyncpa [#allocation6], 0  ;;  %s2932_s9 = smov [#allocation4]   ;;  %s2933_s11 = smov [#allocation7]  }
   0x3   :  { %s16_s10 = sshll.u32 %s2932_s9, 4  ;;  %s25_s12 = sshll.u32 %s2933_s11, 4  ;;  %s17_s10 = int_to_ptr.vmem [resolvable:$true] %s16_s10  ;;  %s26_s12 = int_to_ptr.vmem [resolvable:$true] %s25_s12 }
   0x4   :  { %s2874_s13 = scalar_lea.vmem %s17_s10, 128  ;;  %p2879_p1 = scmp.lt.s32.totalorder %s17_s10, %s17_s10 }
   0x5   :  { %p2875_p0 = scmp.ne.s32.totalorder %s17_s10, %s2874_s13  ;;  %p2880_p2 = scmp.lt.s32.totalorder %s2874_s13, %s2874_s13 }
   0x7   :  { %p2881_p3 = por %p2880_p2, %p2879_p1 }
   0x9   :  { %p2882_p4 = pnand %p2881_p3, %p2875_p0 }
   0xb   :  { %2885 = shalt.err (!%p2882_p4)
}
   0xc   :  { %19 = dma.hbm_to_vmem [thread:$0]  %s3398_s0, 128, %s17_s10, [#allocation5]  }
   0xd   :  { %s2894_s16 = scalar_lea.vmem %s26_s12, 2688  ;;  %p2899_p6 = scmp.lt.s32.totalorder %s26_s12, %s26_s12 }
   0xe   :  { %p2895_p5 = scmp.ne.s32.totalorder %s26_s12, %s2894_s16  ;;  %p2900_p7 = scmp.lt.s32.totalorder %s2894_s16, %s2894_s16 }
  0x10   :  { %p2901_p8 = por %p2900_p7, %p2899_p6 }
  0x12   :  { %p2902_p9 = pnand %p2901_p8, %p2895_p5 }
  0x14   :  { %2905 = shalt.err (!%p2902_p9)
}
  0x15   :  { %s2934_s17 = smov 128   ;;  %s2935_s18 = smov 8  }
  0x16   :  { %31 = dma.hbm_to_vmem [thread:$0]  %s3399_s1, 2688, %s26_s12, [#allocation8], %s2934_s17, %s2934_s17, %s2935_s18  }
  0x17   :  { %2926 = dma.done.wait [#allocation5], 128  }
  0x18   :  { %2927 = vsyncadd [#allocation5], 4294967168 }
  0x19   :  { %2928 = dma.done.wait [#allocation8], 2688  }
  0x1a   :  { %2929 = vsyncadd [#allocation8], 4294964608  ;;  %v2936_v0 = vmov 0.0   ;;  %vm2937_vm0 = vmmov 0   ;;  %v39_v1 = vld [vmem:[#allocation7 + $0x8] sm:$0xff]  ;;  %v38_v2 = vld [vmem:[#allocation7] sm:$0xff] }
  0x1b   :  { %2511 = vmatprep.subr.mxu0 %v2936_v0  ;;  %2515 = vmatprep.mubr.msk.f32.mxu0 %vm2937_vm0, %v2936_v0  ;;  %v59_v3 = vld [vmem:[#allocation4] sm:$0xff]  ;;  %vm64_vm1 = vcmask 130048   ;;  %v2968_v4 = vld [vmem:[#allocation7 + $0x28] sm:$0xff]  ;;  %v2970_v5 = vld [vmem:[#allocation7 + $0x20] sm:$0xff]  ;;  %s2938_s0 = smov 64   ;;  %s2939_s1 = smov 32  }
  0x1c   :  { %2518 = vmatprep.subr.mxu1 %v2936_v0  ;;  %2526 = vmatprep.mubr.msk.f32.mxu1 %vm2937_vm0, %v2936_v0  ;;  %v2975_v6 = vld [vmem:[#allocation7 + $0x18] sm:$0xff]  ;;  %v2979_v7 = vld [vmem:[#allocation7 + $0x10] sm:$0xff]  ;;  %v3006_v25 = vld [vmem:[#allocation7 + $0x48] sm:$0xff]  ;;  %vm140_vm2 = vcmask 261120   ;;  %vm497_vm3 = vcmask 253952   ;;  %s2940_s21 = smov [#allocation9]  }
  0x1d   :  { %2512 = vmatpush3.msra.mxu0 %v39_v1  ;;  %2519 = vmatpush3.msra.mxu1 %v2968_v4  ;;  %v2357_v8 = vld [vmem:[#allocation7 + $0x30] ss:$0 sm:$0xff]  ;;  %v3010_v26 = vld [vmem:[#allocation7 + $0x40] sm:$0xff]  ;;  %v3014_v27 = vld [vmem:[#allocation7 + $0x38] sm:$0xff]  ;;  %s2347_s22 = sshll.u32 %s2940_s21, 4  ;;  %s2348_s22 = int_to_ptr.vmem [resolvable:$true] %s2347_s22 }
  0x1e   :  { %2513 = vmatprep.subr.mxu0 %v2936_v0  ;;  %2520 = vmatprep.subr.mxu1 %v2936_v0  ;;  %v3004_v24 = vld [vmem:[#allocation7 + $0x50] sm:$0xff]  ;;  %v3026_v33 = vld [vmem:[#allocation7 + $0x68] sm:$0xff]  ;;  %v3032_v34 = vld [vmem:[#allocation7 + $0x60] sm:$0xff]  ;;  %s2906_s23 = scalar_lea.vmem %s2348_s22, 128  ;;  %p2911_p11 = scmp.lt.s32.totalorder %s2348_s22, %s2348_s22 }
  0x1f   :  { %2514 = vmatpush3.msra.mxu0 %v38_v2  ;;  %2521 = vmatpush3.msra.mxu1 %v2970_v5  ;;  %v3022_v31 = vld [vmem:[#allocation7 + $0x70] sm:$0xff]  ;;  %v3038_v35 = vld [vmem:[#allocation7 + $0x58] sm:$0xff]  ;;  %p2907_p10 = scmp.ne.s32.totalorder %s2348_s22, %s2906_s23  ;;  %p2912_p12 = scmp.lt.s32.totalorder %s2906_s23, %s2906_s23 }
  0x20   :  { %2516 = vmatmul.mubr.msk.f32.vlgmr.msra.gmra.mxu0 %vm64_vm1, %v59_v3  ;;  %2522 = vmatprep.subr.mxu1 %v2936_v0  ;;  %v3063_v42 = vld [vmem:[#allocation7 + $0x78] sm:$0x1] }
  0x21   :  { %2529 = vmatprep.subr.mxu0 %v2936_v0  ;;  %2523 = vmatpush3.msra.mxu1 %v2975_v6  ;;  %p2913_p13 = por %p2912_p12, %p2911_p11 }
  0x22   :  { %2530 = vmatpush3.msra.mxu0 %v2968_v4  ;;  %2524 = vmatprep.subr.mxu1 %v2936_v0 }
  0x23   :  { %2531 = vmatprep.subr.mxu0 %v2936_v0  ;;  %2525 = vmatpush3.msra.mxu1 %v2979_v7  ;;  %p2914_p0 = pnand %p2913_p13, %p2907_p10 }
  0x24   :  { %2532 = vmatpush3.msra.mxu0 %v2970_v5  ;;  %2527 = vmatmul.mubr.f32.vlgmr.msra.gmra.mxu1 %v2936_v0 }
  0x25   :  { %2540 = vmatprep.subr.mxu1 %v2936_v0  ;;  %2533 = vmatprep.subr.mxu0 %v2936_v0 }
  0x26   :  { %2537 = vmatprep.mubr.msk.f32.mxu0 %vm2937_vm0, %v2936_v0  ;;  %2534 = vmatpush3.msra.mxu0 %v2975_v6 }
  0x27   :  { %2548 = vmatprep.mubr.msk.f32.mxu1 %vm2937_vm0, %v2936_v0  ;;  %2535 = vmatprep.subr.mxu0 %v2936_v0 }
  0x28   :  { %2536 = vmatpush3.msra.mxu0 %v2979_v7  ;;  %2541 = vmatpush3.msra.mxu1 %v3004_v24 }
  0x29   :  { %2551 = vmatprep.subr.mxu0 %v2936_v0  ;;  %2542 = vmatprep.subr.mxu1 %v2936_v0 }
  0x2a   :  { %2543 = vmatpush3.msra.mxu1 %v3006_v25 }
  0x2b   :  { %2544 = vmatprep.subr.mxu1 %v2936_v0 }
  0x2c   :  { %2545 = vmatpush3.msra.mxu1 %v3010_v26 }
  0x2d   :  { %2546 = vmatprep.subr.mxu1 %v2936_v0 }
  0x2e   :  { %2547 = vmatpush3.msra.mxu1 %v3014_v27 }
  0x2f   :  { %2562 = vmatprep.subr.mxu1 %v2936_v0 }
  0xe0   :  { %v134_v9 = vpop.f32.mrf.mxu0 }
  0xe1   :  { %v135_v10 = vadd.f32 %v2357_v8, %v134_v9 }
  0xe2   :  { %v2517_v11 = vpop.f32.mrf.mxu0 }
  0xe3   :  { %138 = vst [vmem:[#allocation2] sm:$0xff] %v135_v10 }
  0xe4   :  { %v210_v12 = vpop.f32.mrf.mxu1 }
  0xe6   :  { %v2528_v13 = vpop.f32.mrf.mxu1 }
  0xea   :  { %v139_v14 = vld [vmem:[#allocation2] sm:$0x1]  ;;  %v235_v36 = vld [vmem:[#allocation2 + $0x1] sm:$0x1] }
  0xeb   :  { %v214_v15 = vadd.f32 %v210_v12, %v139_v14  ;;  %v499_v12 = vld [vmem:[#allocation2 + $0x2] sm:$0x1] }
  0xed   :  { %2802 = vtanh.f32 %v214_v15 }
  0xfa   :  { %v2803_v16 = vpop.eup %2802 }
  0xfb   :  { %220 = vrot.lane.b32.xlu0 %v2803_v16, %s2938_s0  ;;  %v216_v17 = vmul.f32 0.5, %v2803_v16 }
  0xfd   :  { %v217_v18 = vadd.f32 0.5, %v216_v17 }
  0xff   :  { %v218_v21 = vmul.f32 0.0, %v217_v18 }
 0x16d   :  { %v221_v19 = vpop.permute.xlu0 %220 }
 0x16e   :  { %v223_v20 = vmul.f32 %v221_v19, %v217_v18 }
 0x170   :  { %225 = vrot.lane.b32.xlu0 %v223_v20, %s2939_s1 }
 0x1e2   :  { %v226_v22 = vpop.permute.xlu0 %225 }
 0x1e3   :  { %v3001_v23 = vadd.f32 %v226_v22, %v218_v21 }
 0x1e5   :  { %2804 = vtanh.f32 %v3001_v23 }
 0x1f2   :  { %v2805_v28 = vpop.eup %2804 }
 0x1f3   :  { %231 = vrot.lane.b32.xlu1 %v2805_v28, %s2938_s0 }
 0x265   :  { %v232_v29 = vpop.permute.xlu1 %231 }
 0x266   :  { %v234_v30 = vmul.f32 %v232_v29, %v217_v18 }
 0x268   :  { %237 = vrot.lane.b32.xlu1 %v234_v30, %s2939_s1 }
 0x2da   :  { %v238_v32 = vpop.permute.xlu1 %237 }
 0x2db   :  { %2538 = vmatmul.mubr.msk.f32.vlgmr.msra.gmra.mxu0 %vm140_vm2, %v238_v32  ;;  %2549 = vmatmul.mubr.msk.f32.vlgmr.msra.gmra.mxu1 %vm140_vm2, %v238_v32 }
 0x2dc   :  { %2552 = vmatpush3.msra.mxu0 %v3022_v31  ;;  %2559 = vmatprep.mubr.msk.f32.mxu0 %vm2937_vm0, %v2936_v0 }
 0x2dd   :  { %2553 = vmatprep.subr.mxu0 %v2936_v0  ;;  %2563 = vmatpush3.msra.mxu1 %v2968_v4 }
 0x2de   :  { %2554 = vmatpush3.msra.mxu0 %v3026_v33  ;;  %2564 = vmatprep.subr.mxu1 %v2936_v0 }
 0x2df   :  { %2555 = vmatprep.subr.mxu0 %v2936_v0  ;;  %2565 = vmatpush3.msra.mxu1 %v2970_v5 }
 0x2e0   :  { %2556 = vmatpush3.msra.mxu0 %v3032_v34  ;;  %2566 = vmatprep.subr.mxu1 %v2936_v0 }
 0x2e1   :  { %2557 = vmatprep.subr.mxu0 %v2936_v0  ;;  %2567 = vmatpush3.msra.mxu1 %v2975_v6 }
 0x2e2   :  { %2558 = vmatpush3.msra.mxu0 %v3038_v35  ;;  %2568 = vmatprep.subr.mxu1 %v2936_v0 }
 0x2e3   :  { %2560 = vmatmul.mubr.f32.vlgmr.msra.gmra.mxu0 %v2936_v0  ;;  %2573 = vmatprep.subr.mxu0 %v2936_v0 }
 0x2e4   :  { %2574 = vmatpush3.msra.mxu0 %v3004_v24  ;;  %2569 = vmatpush3.msra.mxu1 %v2979_v7 }
 0x2e5   :  { %2575 = vmatprep.subr.mxu0 %v2936_v0  ;;  %2570 = vmatprep.mubr.msk.f32.mxu1 %vm2937_vm0, %v2936_v0 }
 0x2e6   :  { %2576 = vmatpush3.msra.mxu0 %v3006_v25  ;;  %2581 = vmatprep.mubr.msk.f32.mxu0 %vm2937_vm0, %v2936_v0 }
 0x2e7   :  { %2577 = vmatprep.subr.mxu0 %v2936_v0  ;;  %2584 = vmatprep.subr.mxu1 %v2936_v0 }
 0x2e8   :  { %2578 = vmatpush3.msra.mxu0 %v3010_v26 }
 0x2e9   :  { %2579 = vmatprep.subr.mxu0 %v2936_v0 }
 0x2ea   :  { %2580 = vmatpush3.msra.mxu0 %v3014_v27 }
 0x2eb   :  { %2595 = vmatprep.subr.mxu0 %v2936_v0 }
 0x39b   :  { %v307_v37 = vpop.f32.mrf.mxu0  ;;  %v398_v38 = vpop.f32.mrf.mxu1 }
 0x39c   :  { %v311_v39 = vadd.f32 %v307_v37, %v235_v36  ;;  %v399_v43 = vadd.f32 %v398_v38, %v3063_v42 }
 0x39d   :  { %v2539_v40 = vpop.f32.mrf.mxu0  ;;  %v2550_v41 = vpop.f32.mrf.mxu1 }
 0x39e   :  { %2806 = vtanh.f32 %v311_v39 }
 0x3a3   :  { %v468_v44 = vpop.f32.mrf.mxu0 }
 0x3a4   :  { %v472_v45 = vadd.f32 %v468_v44, %v399_v43 }
 0x3a5   :  { %v2561_v46 = vpop.f32.mrf.mxu0 }
 0x3a6   :  { %2808 = vtanh.f32 %v472_v45 }
 0x3ab   :  { %v2807_v47 = vpop.eup %2806 }
 0x3ac   :  { %317 = vrot.lane.b32.xlu0 %v2807_v47, %s2938_s0  ;;  %v313_v49 = vmul.f32 0.5, %v2807_v47 }
 0x3ae   :  { %v314_v50 = vadd.f32 0.5, %v313_v49 }
 0x3b0   :  { %v315_v57 = vmul.f32 %v314_v50, %v3001_v23 }
 0x3b3   :  { %v2809_v48 = vpop.eup %2808 }
 0x3b4   :  { %478 = vrot.lane.b32.xlu1 %v2809_v48, %s2938_s0  ;;  %v474_v53 = vmul.f32 0.5, %v2809_v48 }
 0x3b6   :  { %v475_v54 = vadd.f32 0.5, %v474_v53 }
 0x3b8   :  { %v476_v60 = vmul.f32 0.0, %v475_v54 }
 0x41e   :  { %v318_v51 = vpop.permute.xlu0 %317 }
 0x41f   :  { %v320_v52 = vmul.f32 %v318_v51, %v314_v50 }
 0x421   :  { %322 = vrot.lane.b32.xlu0 %v320_v52, %s2939_s1 }
 0x426   :  { %v479_v55 = vpop.permute.xlu1 %478 }
 0x427   :  { %v481_v56 = vmul.f32 %v479_v55, %v475_v54  ;;  %v764_v55 = vld [vmem:[#allocation2 + $0x3] sm:$0x1] }
 0x429   :  { %483 = vrot.lane.b32.xlu1 %v481_v56, %s2939_s1 }
 0x493   :  { %v323_v58 = vpop.permute.xlu0 %322 }
 0x494   :  { %v3071_v59 = vadd.f32 %v323_v58, %v315_v57 }
 0x496   :  { %2810 = vtanh.f32 %v3071_v59 }
 0x49b   :  { %v484_v61 = vpop.permute.xlu1 %483 }
 0x49c   :  { %v3074_v62 = vadd.f32 %v484_v61, %v476_v60 }
 0x49e   :  { %2812 = vtanh.f32 %v3074_v62 }
 0x4a3   :  { %v2811_v63 = vpop.eup %2810 }
 0x4a4   :  { %328 = vrot.lane.b32.xlu0 %v2811_v63, %s2938_s0 }
 0x4ab   :  { %v2813_v1 = vpop.eup %2812 }
 0x4ac   :  { %489 = vrot.lane.b32.xlu1 %v2813_v1, %s2938_s0 }
 0x516   :  { %v329_v2 = vpop.permute.xlu0 %328 }
 0x517   :  { %v331_v3 = vmul.f32 %v329_v2, %v314_v50 }
 0x519   :  { %501 = vrot.lane.b32.xlu0 %v331_v3, %s2939_s1 }
 0x51e   :  { %v490_v8 = vpop.permute.xlu1 %489 }
 0x51f   :  { %v492_v9 = vmul.f32 %v490_v8, %v475_v54 }
 0x521   :  { %494 = vrot.lane.b32.xlu1 %v492_v9, %s2939_s1 }
 0x58b   :  { %v502_v10 = vpop.permute.xlu0 %501 }
 0x58c   :  { %2571 = vmatmul.mubr.msk.f32.vlgmr.msra.gmra.mxu1 %vm140_vm2, %v502_v10  ;;  %2582 = vmatmul.mubr.msk.f32.vlgmr.msra.gmra.mxu0 %vm140_vm2, %v502_v10 }
 0x58d   :  { %2585 = vmatpush3.msra.mxu1 %v3022_v31  ;;  %2592 = vmatprep.mubr.msk.f32.mxu1 %vm2937_vm0, %v2936_v0 }
 0x58e   :  { %2586 = vmatprep.subr.mxu1 %v2936_v0  ;;  %2596 = vmatpush3.msra.mxu0 %v2968_v4 }
 0x58f   :  { %2587 = vmatpush3.msra.mxu1 %v3026_v33  ;;  %2597 = vmatprep.subr.mxu0 %v2936_v0 }
 0x590   :  { %2588 = vmatprep.subr.mxu1 %v2936_v0  ;;  %2598 = vmatpush3.msra.mxu0 %v2970_v5 }
 0x591   :  { %2589 = vmatpush3.msra.mxu1 %v3032_v34  ;;  %2599 = vmatprep.subr.mxu0 %v2936_v0 }
 0x592   :  { %2590 = vmatprep.subr.mxu1 %v2936_v0  ;;  %2600 = vmatpush3.msra.mxu0 %v2975_v6 }
 0x593   :  { %2591 = vmatpush3.msra.mxu1 %v3038_v35  ;;  %v495_v11 = vpop.permute.xlu1 %494  ;;  %2601 = vmatprep.subr.mxu0 %v2936_v0 }
 0x594   :  { %498 = vst.msk [vmem:[#allocation3] sm:$0x1] %vm497_vm3, %v495_v11  ;;  %2593 = vmatmul.mubr.msk.f32.vlgmr.msra.gmra.mxu1 %vm140_vm2, %v495_v11  ;;  %2606 = vmatprep.subr.mxu1 %v2936_v0 }
 0x595   :  { %2607 = vmatpush3.msra.mxu1 %v3004_v24  ;;  %2602 = vmatpush3.msra.mxu0 %v2979_v7 }
 0x596   :  { %2608 = vmatprep.subr.mxu1 %v2936_v0  ;;  %2603 = vmatprep.mubr.msk.f32.mxu0 %vm2937_vm0, %v2936_v0 }
 0x597   :  { %2609 = vmatpush3.msra.mxu1 %v3006_v25  ;;  %2617 = vmatprep.subr.mxu0 %v2936_v0 }
 0x598   :  { %2610 = vmatprep.subr.mxu1 %v2936_v0  ;;  %2614 = vmatprep.mubr.msk.f32.mxu1 %vm2937_vm0, %v2936_v0 }
 0x599   :  { %2611 = vmatpush3.msra.mxu1 %v3010_v26 }
 0x59a   :  { %2612 = vmatprep.subr.mxu1 %v2936_v0 }
 0x59b   :  { %2613 = vmatpush3.msra.mxu1 %v3014_v27 }
 0x59c   :  { %2628 = vmatprep.subr.mxu1 %v2936_v0 }
 0x64c   :  { %v571_v13 = vpop.f32.mrf.mxu1  ;;  %v662_v14 = vpop.f32.mrf.mxu0 }
 0x64d   :  { %v575_v15 = vadd.f32 %v571_v13, %v499_v12  ;;  %v663_v18 = vadd.f32 %v662_v14, %v3063_v42 }
 0x64e   :  { %v2572_v16 = vpop.f32.mrf.mxu1  ;;  %v2583_v17 = vpop.f32.mrf.mxu0 }
 0x64f   :  { %2814 = vtanh.f32 %v575_v15 }
 0x654   :  { %v734_v19 = vpop.f32.mrf.mxu1 }
 0x655   :  { %v738_v20 = vadd.f32 %v734_v19, %v663_v18 }
 0x656   :  { %v2594_v21 = vpop.f32.mrf.mxu1 }
 0x657   :  { %2816 = vtanh.f32 %v738_v20 }
 0x65c   :  { %v2815_v22 = vpop.eup %2814 }
 0x65d   :  { %581 = vrot.lane.b32.xlu0 %v2815_v22, %s2938_s0  ;;  %v577_v28 = vmul.f32 0.5, %v2815_v22 }
 0x65f   :  { %v578_v29 = vadd.f32 0.5, %v577_v28 }
 0x661   :  { %v579_v40 = vmul.f32 %v578_v29, %v3071_v59 }
 0x664   :  { %v2817_v23 = vpop.eup %2816 }
 0x665   :  { %744 = vrot.lane.b32.xlu1 %v2817_v23, %s2938_s0  ;;  %v740_v36 = vmul.f32 0.5, %v2817_v23 }
 0x667   :  { %v741_v37 = vadd.f32 0.5, %v740_v36 }
 0x669   :  { %v742_v44 = vmul.f32 %v741_v37, %v3074_v62 }
 0x6cf   :  { %v582_v30 = vpop.permute.xlu0 %581 }
 0x6d0   :  { %v584_v32 = vmul.f32 %v582_v30, %v578_v29 }
 0x6d2   :  { %586 = vrot.lane.b32.xlu0 %v584_v32, %s2939_s1 }
 0x6d7   :  { %v745_v38 = vpop.permute.xlu1 %744 }
 0x6d8   :  { %v747_v39 = vmul.f32 %v745_v38, %v741_v37  ;;  %v1029_v38 = vld [vmem:[#allocation2 + $0x4] sm:$0x1] }
 0x6da   :  { %749 = vrot.lane.b32.xlu1 %v747_v39, %s2939_s1 }
 0x744   :  { %v587_v41 = vpop.permute.xlu0 %586 }
 0x745   :  { %v3121_v43 = vadd.f32 %v587_v41, %v579_v40 }
 0x747   :  { %2818 = vtanh.f32 %v3121_v43 }
 0x74c   :  { %v750_v45 = vpop.permute.xlu1 %749 }
 0x74d   :  { %v3125_v46 = vadd.f32 %v750_v45, %v742_v44 }
 0x74f   :  { %2820 = vtanh.f32 %v3125_v46 }
 0x754   :  { %v2819_v47 = vpop.eup %2818 }
 0x755   :  { %592 = vrot.lane.b32.xlu0 %v2819_v47, %s2938_s0 }
 0x75c   :  { %v2821_v48 = vpop.eup %2820 }
 0x75d   :  { %755 = vrot.lane.b32.xlu1 %v2821_v48, %s2938_s0 }
 0x7c7   :  { %v593_v49 = vpop.permute.xlu0 %592 }
 0x7c8   :  { %v595_v50 = vmul.f32 %v593_v49, %v578_v29 }
 0x7ca   :  { %766 = vrot.lane.b32.xlu0 %v595_v50, %s2939_s1 }
 0x7cf   :  { %v756_v51 = vpop.permute.xlu1 %755 }
 0x7d0   :  { %v758_v52 = vmul.f32 %v756_v51, %v741_v37 }
 0x7d2   :  { %760 = vrot.lane.b32.xlu1 %v758_v52, %s2939_s1 }
 0x83c   :  { %v767_v53 = vpop.permute.xlu0 %766 }
 0x83d   :  { %2604 = vmatmul.mubr.msk.f32.vlgmr.msra.gmra.mxu0 %vm140_vm2, %v767_v53  ;;  %2615 = vmatmul.mubr.msk.f32.vlgmr.msra.gmra.mxu1 %vm140_vm2, %v767_v53 }
 0x83e   :  { %2618 = vmatpush3.msra.mxu0 %v3022_v31  ;;  %2625 = vmatprep.mubr.msk.f32.mxu0 %vm2937_vm0, %v2936_v0 }
 0x83f   :  { %2619 = vmatprep.subr.mxu0 %v2936_v0  ;;  %2629 = vmatpush3.msra.mxu1 %v2968_v4 }
 0x840   :  { %2620 = vmatpush3.msra.mxu0 %v3026_v33  ;;  %2630 = vmatprep.subr.mxu1 %v2936_v0 }
 0x841   :  { %2621 = vmatprep.subr.mxu0 %v2936_v0  ;;  %2631 = vmatpush3.msra.mxu1 %v2970_v5 }
 0x842   :  { %2622 = vmatpush3.msra.mxu0 %v3032_v34  ;;  %2632 = vmatprep.subr.mxu1 %v2936_v0 }
 0x843   :  { %2623 = vmatprep.subr.mxu0 %v2936_v0  ;;  %2633 = vmatpush3.msra.mxu1 %v2975_v6 }
 0x844   :  { %2624 = vmatpush3.msra.mxu0 %v3038_v35  ;;  %v761_v54 = vpop.permute.xlu1 %760  ;;  %2634 = vmatprep.subr.mxu1 %v2936_v0 }
 0x845   :  { %763 = vst.msk [vmem:[#allocation3 + $0x1] sm:$0x1] %vm497_vm3, %v761_v54  ;;  %2626 = vmatmul.mubr.msk.f32.vlgmr.msra.gmra.mxu0 %vm140_vm2, %v761_v54  ;;  %2639 = vmatprep.subr.mxu0 %v2936_v0 }
 0x846   :  { %2640 = vmatpush3.msra.mxu0 %v3004_v24  ;;  %2635 = vmatpush3.msra.mxu1 %v2979_v7 }
 0x847   :  { %2641 = vmatprep.subr.mxu0 %v2936_v0  ;;  %2636 = vmatprep.mubr.msk.f32.mxu1 %vm2937_vm0, %v2936_v0 }
 0x848   :  { %2642 = vmatpush3.msra.mxu0 %v3006_v25  ;;  %2647 = vmatprep.mubr.msk.f32.mxu0 %vm2937_vm0, %v2936_v0 }
 0x849   :  { %2643 = vmatprep.subr.mxu0 %v2936_v0  ;;  %2650 = vmatprep.subr.mxu1 %v2936_v0 }
 0x84a   :  { %2644 = vmatpush3.msra.mxu0 %v3010_v26 }
 0x84b   :  { %2645 = vmatprep.subr.mxu0 %v2936_v0 }
 0x84c   :  { %2646 = vmatpush3.msra.mxu0 %v3014_v27 }
 0x84d   :  { %2661 = vmatprep.subr.mxu0 %v2936_v0 }
 0x8fd   :  { %v836_v56 = vpop.f32.mrf.mxu0  ;;  %v927_v57 = vpop.f32.mrf.mxu1 }
 0x8fe   :  { %v840_v58 = vadd.f32 %v836_v56, %v764_v55  ;;  %v928_v61 = vadd.f32 %v927_v57, %v3063_v42 }
 0x8ff   :  { %v2605_v59 = vpop.f32.mrf.mxu0  ;;  %v2616_v60 = vpop.f32.mrf.mxu1 }
 0x900   :  { %2822 = vtanh.f32 %v840_v58 }
 0x905   :  { %v999_v62 = vpop.f32.mrf.mxu0 }
 0x906   :  { %v1003_v63 = vadd.f32 %v999_v62, %v928_v61 }
 0x907   :  { %v2627_v1 = vpop.f32.mrf.mxu0 }
 0x908   :  { %2824 = vtanh.f32 %v1003_v63 }
 0x90d   :  { %v2823_v2 = vpop.eup %2822 }
 0x90e   :  { %846 = vrot.lane.b32.xlu0 %v2823_v2, %s2938_s0  ;;  %v842_v8 = vmul.f32 0.5, %v2823_v2 }
 0x910   :  { %v843_v9 = vadd.f32 0.5, %v842_v8 }
 0x912   :  { %v844_v16 = vmul.f32 %v843_v9, %v3121_v43 }
 0x915   :  { %v2825_v3 = vpop.eup %2824 }
 0x916   :  { %1009 = vrot.lane.b32.xlu1 %v2825_v3, %s2938_s0  ;;  %v1005_v12 = vmul.f32 0.5, %v2825_v3 }
 0x918   :  { %v1006_v13 = vadd.f32 0.5, %v1005_v12 }
 0x91a   :  { %v1007_v19 = vmul.f32 %v1006_v13, %v3125_v46 }
 0x980   :  { %v847_v10 = vpop.permute.xlu0 %846 }
 0x981   :  { %v849_v11 = vmul.f32 %v847_v10, %v843_v9 }
 0x983   :  { %851 = vrot.lane.b32.xlu0 %v849_v11, %s2939_s1 }
 0x988   :  { %v1010_v14 = vpop.permute.xlu1 %1009 }
 0x989   :  { %v1012_v15 = vmul.f32 %v1010_v14, %v1006_v13  ;;  %v1294_v14 = vld [vmem:[#allocation2 + $0x5] sm:$0x1] }
 0x98b   :  { %1014 = vrot.lane.b32.xlu1 %v1012_v15, %s2939_s1 }
 0x9f5   :  { %v852_v17 = vpop.permute.xlu0 %851 }
 0x9f6   :  { %v3172_v18 = vadd.f32 %v852_v17, %v844_v16 }
 0x9f8   :  { %2826 = vtanh.f32 %v3172_v18 }
 0x9fd   :  { %v1015_v20 = vpop.permute.xlu1 %1014 }
 0x9fe   :  { %v3176_v21 = vadd.f32 %v1015_v20, %v1007_v19 }
 0xa00   :  { %2828 = vtanh.f32 %v3176_v21 }
 0xa05   :  { %v2827_v22 = vpop.eup %2826 }
 0xa06   :  { %857 = vrot.lane.b32.xlu0 %v2827_v22, %s2938_s0 }
 0xa0d   :  { %v2829_v23 = vpop.eup %2828 }
 0xa0e   :  { %1020 = vrot.lane.b32.xlu1 %v2829_v23, %s2938_s0 }
 0xa78   :  { %v858_v28 = vpop.permute.xlu0 %857 }
 0xa79   :  { %v860_v29 = vmul.f32 %v858_v28, %v843_v9 }
 0xa7b   :  { %1031 = vrot.lane.b32.xlu0 %v860_v29, %s2939_s1 }
 0xa80   :  { %v1021_v30 = vpop.permute.xlu1 %1020 }
 0xa81   :  { %v1023_v32 = vmul.f32 %v1021_v30, %v1006_v13 }
 0xa83   :  { %1025 = vrot.lane.b32.xlu1 %v1023_v32, %s2939_s1 }
 0xaed   :  { %v1032_v36 = vpop.permute.xlu0 %1031 }
 0xaee   :  { %2637 = vmatmul.mubr.msk.f32.vlgmr.msra.gmra.mxu1 %vm140_vm2, %v1032_v36  ;;  %2648 = vmatmul.mubr.msk.f32.vlgmr.msra.gmra.mxu0 %vm140_vm2, %v1032_v36 }
 0xaef   :  { %2651 = vmatpush3.msra.mxu1 %v3022_v31  ;;  %2658 = vmatprep.mubr.msk.f32.mxu1 %vm2937_vm0, %v2936_v0 }
 0xaf0   :  { %2652 = vmatprep.subr.mxu1 %v2936_v0  ;;  %2662 = vmatpush3.msra.mxu0 %v2968_v4 }
 0xaf1   :  { %2653 = vmatpush3.msra.mxu1 %v3026_v33  ;;  %2663 = vmatprep.subr.mxu0 %v2936_v0 }
 0xaf2   :  { %2654 = vmatprep.subr.mxu1 %v2936_v0  ;;  %2664 = vmatpush3.msra.mxu0 %v2970_v5 }
 0xaf3   :  { %2655 = vmatpush3.msra.mxu1 %v3032_v34  ;;  %2665 = vmatprep.subr.mxu0 %v2936_v0 }
 0xaf4   :  { %2656 = vmatprep.subr.mxu1 %v2936_v0  ;;  %2666 = vmatpush3.msra.mxu0 %v2975_v6 }
 0xaf5   :  { %2657 = vmatpush3.msra.mxu1 %v3038_v35  ;;  %v1026_v37 = vpop.permute.xlu1 %1025  ;;  %2667 = vmatprep.subr.mxu0 %v2936_v0 }
 0xaf6   :  { %1028 = vst.msk [vmem:[#allocation3 + $0x2] sm:$0x1] %vm497_vm3, %v1026_v37  ;;  %2659 = vmatmul.mubr.msk.f32.vlgmr.msra.gmra.mxu1 %vm140_vm2, %v1026_v37  ;;  %2672 = vmatprep.subr.mxu1 %v2936_v0 }
 0xaf7   :  { %2673 = vmatpush3.msra.mxu1 %v3004_v24  ;;  %2668 = vmatpush3.msra.mxu0 %v2979_v7 }
 0xaf8   :  { %2674 = vmatprep.subr.mxu1 %v2936_v0  ;;  %2669 = vmatprep.mubr.msk.f32.mxu0 %vm2937_vm0, %v2936_v0 }
 0xaf9   :  { %2675 = vmatpush3.msra.mxu1 %v3006_v25  ;;  %2683 = vmatprep.subr.mxu0 %v2936_v0 }
 0xafa   :  { %2676 = vmatprep.subr.mxu1 %v2936_v0  ;;  %2680 = vmatprep.mubr.msk.f32.mxu1 %vm2937_vm0, %v2936_v0 }
 0xafb   :  { %2677 = vmatpush3.msra.mxu1 %v3010_v26 }
 0xafc   :  { %2678 = vmatprep.subr.mxu1 %v2936_v0 }
 0xafd   :  { %2679 = vmatpush3.msra.mxu1 %v3014_v27 }
 0xafe   :  { %2694 = vmatprep.subr.mxu1 %v2936_v0 }
 0xbae   :  { %v1101_v39 = vpop.f32.mrf.mxu1  ;;  %v1192_v40 = vpop.f32.mrf.mxu0 }
 0xbaf   :  { %v1105_v41 = vadd.f32 %v1101_v39, %v1029_v38  ;;  %v1193_v45 = vadd.f32 %v1192_v40, %v3063_v42 }
 0xbb0   :  { %v2638_v43 = vpop.f32.mrf.mxu1  ;;  %v2649_v44 = vpop.f32.mrf.mxu0 }
 0xbb1   :  { %2830 = vtanh.f32 %v1105_v41 }
 0xbb6   :  { %v1264_v46 = vpop.f32.mrf.mxu1 }
 0xbb7   :  { %v1268_v47 = vadd.f32 %v1264_v46, %v1193_v45 }
 0xbb8   :  { %v2660_v48 = vpop.f32.mrf.mxu1 }
 0xbb9   :  { %2832 = vtanh.f32 %v1268_v47 }
 0xbbe   :  { %v2831_v49 = vpop.eup %2830 }
 0xbbf   :  { %1111 = vrot.lane.b32.xlu0 %v2831_v49, %s2938_s0  ;;  %v1107_v51 = vmul.f32 0.5, %v2831_v49 }
 0xbc1   :  { %v1108_v52 = vadd.f32 0.5, %v1107_v51 }
 0xbc3   :  { %v1109_v59 = vmul.f32 %v1108_v52, %v3172_v18 }
 0xbc6   :  { %v2833_v50 = vpop.eup %2832 }
 0xbc7   :  { %1274 = vrot.lane.b32.xlu1 %v2833_v50, %s2938_s0  ;;  %v1270_v55 = vmul.f32 0.5, %v2833_v50 }
 0xbc9   :  { %v1271_v56 = vadd.f32 0.5, %v1270_v55 }
 0xbcb   :  { %v1272_v62 = vmul.f32 %v1271_v56, %v3176_v21 }
 0xc31   :  { %v1112_v53 = vpop.permute.xlu0 %1111 }
 0xc32   :  { %v1114_v54 = vmul.f32 %v1112_v53, %v1108_v52 }
 0xc34   :  { %1116 = vrot.lane.b32.xlu0 %v1114_v54, %s2939_s1 }
 0xc39   :  { %v1275_v57 = vpop.permute.xlu1 %1274 }
 0xc3a   :  { %v1277_v58 = vmul.f32 %v1275_v57, %v1271_v56 }
 0xc3c   :  { %1279 = vrot.lane.b32.xlu1 %v1277_v58, %s2939_s1 }
 0xca6   :  { %v1117_v60 = vpop.permute.xlu0 %1116 }
 0xca7   :  { %v3223_v61 = vadd.f32 %v1117_v60, %v1109_v59 }
 0xca9   :  { %2834 = vtanh.f32 %v3223_v61 }
 0xcae   :  { %v1280_v63 = vpop.permute.xlu1 %1279 }
 0xcaf   :  { %v3227_v1 = vadd.f32 %v1280_v63, %v1272_v62 }
 0xcb1   :  { %2836 = vtanh.f32 %v3227_v1 }
 0xcb6   :  { %v2835_v2 = vpop.eup %2834 }
 0xcb7   :  { %1122 = vrot.lane.b32.xlu0 %v2835_v2, %s2938_s0 }
 0xcbe   :  { %v2837_v3 = vpop.eup %2836 }
 0xcbf   :  { %1285 = vrot.lane.b32.xlu1 %v2837_v3, %s2938_s0 }
 0xd29   :  { %v1123_v8 = vpop.permute.xlu0 %1122 }
 0xd2a   :  { %v1125_v9 = vmul.f32 %v1123_v8, %v1108_v52 }
 0xd2c   :  { %1296 = vrot.lane.b32.xlu0 %v1125_v9, %s2939_s1 }
 0xd31   :  { %v1286_v10 = vpop.permute.xlu1 %1285 }
 0xd32   :  { %v1288_v11 = vmul.f32 %v1286_v10, %v1271_v56 }
 0xd34   :  { %1290 = vrot.lane.b32.xlu1 %v1288_v11, %s2939_s1 }
 0xd9e   :  { %v1297_v12 = vpop.permute.xlu0 %1296 }
 0xd9f   :  { %2670 = vmatmul.mubr.msk.f32.vlgmr.msra.gmra.mxu0 %vm140_vm2, %v1297_v12  ;;  %2681 = vmatmul.mubr.msk.f32.vlgmr.msra.gmra.mxu1 %vm140_vm2, %v1297_v12 }
 0xda0   :  { %2684 = vmatpush3.msra.mxu0 %v3022_v31  ;;  %2691 = vmatprep.mubr.msk.f32.mxu0 %vm2937_vm0, %v2936_v0 }
 0xda1   :  { %2685 = vmatprep.subr.mxu0 %v2936_v0  ;;  %2695 = vmatpush3.msra.mxu1 %v2968_v4 }
 0xda2   :  { %2686 = vmatpush3.msra.mxu0 %v3026_v33  ;;  %2696 = vmatprep.subr.mxu1 %v2936_v0 }
 0xda3   :  { %2687 = vmatprep.subr.mxu0 %v2936_v0  ;;  %2697 = vmatpush3.msra.mxu1 %v2970_v5 }
 0xda4   :  { %2688 = vmatpush3.msra.mxu0 %v3032_v34  ;;  %2698 = vmatprep.subr.mxu1 %v2936_v0 }
 0xda5   :  { %2689 = vmatprep.subr.mxu0 %v2936_v0  ;;  %2699 = vmatpush3.msra.mxu1 %v2975_v6 }
 0xda6   :  { %2690 = vmatpush3.msra.mxu0 %v3038_v35  ;;  %v1291_v13 = vpop.permute.xlu1 %1290  ;;  %2700 = vmatprep.subr.mxu1 %v2936_v0 }
 0xda7   :  { %1293 = vst.msk [vmem:[#allocation3 + $0x3] sm:$0x1] %vm497_vm3, %v1291_v13  ;;  %2692 = vmatmul.mubr.msk.f32.vlgmr.msra.gmra.mxu0 %vm140_vm2, %v1291_v13  ;;  %2705 = vmatprep.subr.mxu0 %v2936_v0 }
 0xda8   :  { %2706 = vmatpush3.msra.mxu0 %v3004_v24  ;;  %2701 = vmatpush3.msra.mxu1 %v2979_v7 }
 0xda9   :  { %2707 = vmatprep.subr.mxu0 %v2936_v0  ;;  %2702 = vmatprep.mubr.msk.f32.mxu1 %vm2937_vm0, %v2936_v0 }
 0xdaa   :  { %2708 = vmatpush3.msra.mxu0 %v3006_v25  ;;  %2713 = vmatprep.mubr.msk.f32.mxu0 %vm2937_vm0, %v2936_v0 }
 0xdab   :  { %2709 = vmatprep.subr.mxu0 %v2936_v0  ;;  %2716 = vmatprep.subr.mxu1 %v2936_v0 }
 0xdac   :  { %2710 = vmatpush3.msra.mxu0 %v3010_v26 }
 0xdad   :  { %2711 = vmatprep.subr.mxu0 %v2936_v0 }
 0xdae   :  { %2712 = vmatpush3.msra.mxu0 %v3014_v27 }
 0xdaf   :  { %2727 = vmatprep.subr.mxu0 %v2936_v0 }
 0xe5f   :  { %v1366_v15 = vpop.f32.mrf.mxu0  ;;  %v1457_v16 = vpop.f32.mrf.mxu1 }
 0xe60   :  { %v1370_v17 = vadd.f32 %v1366_v15, %v1294_v14  ;;  %v1458_v20 = vadd.f32 %v1457_v16, %v3063_v42 }
 0xe61   :  { %v2671_v18 = vpop.f32.mrf.mxu0  ;;  %v2682_v19 = vpop.f32.mrf.mxu1 }
 0xe62   :  { %2838 = vtanh.f32 %v1370_v17 }
 0xe67   :  { %v1529_v21 = vpop.f32.mrf.mxu0 }
 0xe68   :  { %v1533_v22 = vadd.f32 %v1529_v21, %v1458_v20 }
 0xe69   :  { %v2693_v23 = vpop.f32.mrf.mxu0 }
 0xe6a   :  { %2840 = vtanh.f32 %v1533_v22 }
 0xe6f   :  { %v2839_v28 = vpop.eup %2838 }
 0xe70   :  { %1376 = vrot.lane.b32.xlu0 %v2839_v28, %s2938_s0  ;;  %v1372_v30 = vmul.f32 0.5, %v2839_v28 }
 0xe72   :  { %v1373_v32 = vadd.f32 0.5, %v1372_v30 }
 0xe74   :  { %v1374_v43 = vmul.f32 %v1373_v32, %v3223_v61 }
 0xe77   :  { %v2841_v29 = vpop.eup %2840 }
 0xe78   :  { %1539 = vrot.lane.b32.xlu1 %v2841_v29, %s2938_s0  ;;  %v1535_v38 = vmul.f32 0.5, %v2841_v29 }
 0xe7a   :  { %v1536_v39 = vadd.f32 0.5, %v1535_v38 }
 0xe7c   :  { %v1537_v46 = vmul.f32 %v1536_v39, %v3227_v1 }
 0xee2   :  { %v1377_v36 = vpop.permute.xlu0 %1376 }
 0xee3   :  { %v1379_v37 = vmul.f32 %v1377_v36, %v1373_v32 }
 0xee5   :  { %1381 = vrot.lane.b32.xlu0 %v1379_v37, %s2939_s1 }
 0xeea   :  { %v1540_v40 = vpop.permute.xlu1 %1539 }
 0xeeb   :  { %v1542_v41 = vmul.f32 %v1540_v40, %v1536_v39 }
 0xeed   :  { %1544 = vrot.lane.b32.xlu1 %v1542_v41, %s2939_s1 }
 0xf57   :  { %v1382_v44 = vpop.permute.xlu0 %1381 }
 0xf58   :  { %v3274_v45 = vadd.f32 %v1382_v44, %v1374_v43 }
 0xf5a   :  { %2842 = vtanh.f32 %v3274_v45 }
 0xf5f   :  { %v1545_v47 = vpop.permute.xlu1 %1544 }
 0xf60   :  { %v3278_v48 = vadd.f32 %v1545_v47, %v1537_v46 }
 0xf62   :  { %2844 = vtanh.f32 %v3278_v48 }
 0xf67   :  { %v2843_v49 = vpop.eup %2842 }
 0xf68   :  { %1387 = vrot.lane.b32.xlu0 %v2843_v49, %s2938_s0 }
 0xf6f   :  { %v2845_v50 = vpop.eup %2844 }
 0xf70   :  { %1550 = vrot.lane.b32.xlu1 %v2845_v50, %s2938_s0 }
 0xfda   :  { %v1388_v51 = vpop.permute.xlu0 %1387 }
 0xfdb   :  { %v1390_v52 = vmul.f32 %v1388_v51, %v1373_v32 }
 0xfdd   :  { %1561 = vrot.lane.b32.xlu0 %v1390_v52, %s2939_s1 }
 0xfe2   :  { %v1551_v53 = vpop.permute.xlu1 %1550 }
 0xfe3   :  { %v1553_v54 = vmul.f32 %v1551_v53, %v1536_v39 }
 0xfe5   :  { %1555 = vrot.lane.b32.xlu1 %v1553_v54, %s2939_s1 }
0x104f   :  { %v1562_v55 = vpop.permute.xlu0 %1561 }
0x1050   :  { %2703 = vmatmul.mubr.msk.f32.vlgmr.msra.gmra.mxu1 %vm140_vm2, %v1562_v55  ;;  %2714 = vmatmul.mubr.msk.f32.vlgmr.msra.gmra.mxu0 %vm140_vm2, %v1562_v55 }
0x1051   :  { %2717 = vmatpush3.msra.mxu1 %v3022_v31  ;;  %2724 = vmatprep.mubr.msk.f32.mxu1 %vm2937_vm0, %v2936_v0 }
0x1052   :  { %2718 = vmatprep.subr.mxu1 %v2936_v0  ;;  %2728 = vmatpush3.msra.mxu0 %v2968_v4  ;;  %v1559_v4 = vld [vmem:[#allocation2 + $0x6] sm:$0x1] }
0x1053   :  { %2719 = vmatpush3.msra.mxu1 %v3026_v33  ;;  %2729 = vmatprep.subr.mxu0 %v2936_v0 }
0x1054   :  { %2720 = vmatprep.subr.mxu1 %v2936_v0  ;;  %2730 = vmatpush3.msra.mxu0 %v2970_v5 }
0x1055   :  { %2721 = vmatpush3.msra.mxu1 %v3032_v34  ;;  %2731 = vmatprep.subr.mxu0 %v2936_v0 }
0x1056   :  { %2722 = vmatprep.subr.mxu1 %v2936_v0  ;;  %2732 = vmatpush3.msra.mxu0 %v2975_v6 }
0x1057   :  { %2723 = vmatpush3.msra.mxu1 %v3038_v35  ;;  %v1556_v56 = vpop.permute.xlu1 %1555  ;;  %2733 = vmatprep.subr.mxu0 %v2936_v0 }
0x1058   :  { %1558 = vst.msk [vmem:[#allocation3 + $0x4] sm:$0x1] %vm497_vm3, %v1556_v56  ;;  %2725 = vmatmul.mubr.msk.f32.vlgmr.msra.gmra.mxu1 %vm140_vm2, %v1556_v56  ;;  %2738 = vmatprep.subr.mxu1 %v2936_v0 }
0x1059   :  { %2739 = vmatpush3.msra.mxu1 %v3004_v24  ;;  %2734 = vmatpush3.msra.mxu0 %v2979_v7 }
0x105a   :  { %2740 = vmatprep.subr.mxu1 %v2936_v0  ;;  %2735 = vmatprep.mubr.msk.f32.mxu0 %vm2937_vm0, %v2936_v0 }
0x105b   :  { %2741 = vmatpush3.msra.mxu1 %v3006_v25  ;;  %2749 = vmatprep.subr.mxu0 %v2936_v0 }
0x105c   :  { %2742 = vmatprep.subr.mxu1 %v2936_v0  ;;  %2746 = vmatprep.mubr.msk.f32.mxu1 %vm2937_vm0, %v2936_v0 }
0x105d   :  { %2743 = vmatpush3.msra.mxu1 %v3010_v26 }
0x105e   :  { %2744 = vmatprep.subr.mxu1 %v2936_v0 }
0x105f   :  { %2745 = vmatpush3.msra.mxu1 %v3014_v27 }
0x1060   :  { %2760 = vmatprep.subr.mxu1 %v2936_v0 }
0x1110   :  { %v1631_v5 = vpop.f32.mrf.mxu1  ;;  %v1722_v6 = vpop.f32.mrf.mxu0 }
0x1111   :  { %v1635_v7 = vadd.f32 %v1631_v5, %v1559_v4  ;;  %v1723_v59 = vadd.f32 %v1722_v6, %v3063_v42 }
0x1112   :  { %v2704_v57 = vpop.f32.mrf.mxu1  ;;  %v2715_v58 = vpop.f32.mrf.mxu0 }
0x1113   :  { %2846 = vtanh.f32 %v1635_v7 }
0x1118   :  { %v1794_v60 = vpop.f32.mrf.mxu1 }
0x1119   :  { %v1798_v61 = vadd.f32 %v1794_v60, %v1723_v59 }
0x111a   :  { %v2726_v62 = vpop.f32.mrf.mxu1 }
0x111b   :  { %2848 = vtanh.f32 %v1798_v61 }
0x1120   :  { %v2847_v63 = vpop.eup %2846 }
0x1121   :  { %1641 = vrot.lane.b32.xlu0 %v2847_v63, %s2938_s0  ;;  %v1637_v2 = vmul.f32 0.5, %v2847_v63 }
0x1123   :  { %v1638_v3 = vadd.f32 0.5, %v1637_v2 }
0x1125   :  { %v1639_v14 = vmul.f32 %v1638_v3, %v3274_v45 }
0x1128   :  { %v2849_v1 = vpop.eup %2848 }
0x1129   :  { %1804 = vrot.lane.b32.xlu1 %v2849_v1, %s2938_s0  ;;  %v1800_v10 = vmul.f32 0.5, %v2849_v1 }
0x112b   :  { %v1801_v11 = vadd.f32 0.5, %v1800_v10 }
0x112d   :  { %v1802_v17 = vmul.f32 %v1801_v11, %v3278_v48 }
0x1193   :  { %v1642_v8 = vpop.permute.xlu0 %1641 }
0x1194   :  { %v1644_v9 = vmul.f32 %v1642_v8, %v1638_v3 }
0x1196   :  { %1646 = vrot.lane.b32.xlu0 %v1644_v9, %s2939_s1 }
0x119b   :  { %v1805_v12 = vpop.permute.xlu1 %1804 }
0x119c   :  { %v1807_v13 = vmul.f32 %v1805_v12, %v1801_v11 }
0x119e   :  { %1809 = vrot.lane.b32.xlu1 %v1807_v13, %s2939_s1 }
0x1208   :  { %v1647_v15 = vpop.permute.xlu0 %1646 }
0x1209   :  { %v3325_v16 = vadd.f32 %v1647_v15, %v1639_v14  ;;  %v56_v15 = vld [vmem:[#allocation7 + $0x90] sm:$0xff] }
0x120b   :  { %2850 = vtanh.f32 %v3325_v16 }
0x1210   :  { %v1810_v18 = vpop.permute.xlu1 %1809 }
0x1211   :  { %v3329_v19 = vadd.f32 %v1810_v18, %v1802_v17  ;;  %v54_v17 = vld [vmem:[#allocation7 + $0x80] sm:$0xff] }
0x1213   :  { %2852 = vtanh.f32 %v3329_v19 }
0x1218   :  { %v2851_v20 = vpop.eup %2850 }
0x1219   :  { %1652 = vrot.lane.b32.xlu0 %v2851_v20, %s2938_s0 }
0x1220   :  { %v2853_v21 = vpop.eup %2852 }
0x1221   :  { %1815 = vrot.lane.b32.xlu1 %v2853_v21, %s2938_s0 }
0x128b   :  { %v1653_v22 = vpop.permute.xlu0 %1652 }
0x128c   :  { %v1655_v23 = vmul.f32 %v1653_v22, %v1638_v3  ;;  %v2381_v22 = vld [vmem:[#allocation7 + $0xa0] ss:$0 sm:$0xff] }
0x128e   :  { %1826 = vrot.lane.b32.xlu0 %v1655_v23, %s2939_s1 }
0x1293   :  { %v1816_v28 = vpop.permute.xlu1 %1815 }
0x1294   :  { %v1818_v29 = vmul.f32 %v1816_v28, %v1801_v11 }
0x1296   :  { %1820 = vrot.lane.b32.xlu1 %v1818_v29, %s2939_s1 }
0x1300   :  { %v1827_v30 = vpop.permute.xlu0 %1826 }
0x1301   :  { %2736 = vmatmul.mubr.msk.f32.vlgmr.msra.gmra.mxu0 %vm140_vm2, %v1827_v30  ;;  %2747 = vmatmul.mubr.msk.f32.vlgmr.msra.gmra.mxu1 %vm140_vm2, %v1827_v30 }
0x1302   :  { %2750 = vmatpush3.msra.mxu0 %v3022_v31  ;;  %2757 = vmatprep.mubr.msk.f32.mxu0 %vm2937_vm0, %v2936_v0 }
0x1303   :  { %2751 = vmatprep.subr.mxu0 %v2936_v0  ;;  %2761 = vmatpush3.msra.mxu1 %v3004_v24  ;;  %v1824_v24 = vld [vmem:[#allocation2 + $0x7] sm:$0x1] }
0x1304   :  { %2752 = vmatpush3.msra.mxu0 %v3026_v33  ;;  %2762 = vmatprep.subr.mxu1 %v2936_v0 }
0x1305   :  { %2753 = vmatprep.subr.mxu0 %v2936_v0  ;;  %2763 = vmatpush3.msra.mxu1 %v3006_v25 }
0x1306   :  { %2754 = vmatpush3.msra.mxu0 %v3032_v34  ;;  %2764 = vmatprep.subr.mxu1 %v2936_v0 }
0x1307   :  { %2755 = vmatprep.subr.mxu0 %v2936_v0  ;;  %2765 = vmatpush3.msra.mxu1 %v3010_v26 }
0x1308   :  { %2756 = vmatpush3.msra.mxu0 %v3038_v35  ;;  %v1821_v32 = vpop.permute.xlu1 %1820  ;;  %2766 = vmatprep.subr.mxu1 %v2936_v0 }
0x1309   :  { %1823 = vst.msk [vmem:[#allocation3 + $0x5] sm:$0x1] %vm497_vm3, %v1821_v32  ;;  %2758 = vmatmul.mubr.msk.f32.vlgmr.msra.gmra.mxu0 %vm140_vm2, %v1821_v32  ;;  %2767 = vmatpush3.msra.mxu1 %v3014_v27 }
0x130a   :  { %2768 = vmatprep.mubr.msk.f32.mxu1 %vm2937_vm0, %v2936_v0  ;;  %2771 = vmatprep.subr.mxu0 %v2936_v0 }
0x130b   :  { %2772 = vmatpush3.msra.mxu0 %v3022_v31  ;;  %2779 = vmatprep.mubr.msk.f32.mxu0 %vm2937_vm0, %v2936_v0 }
0x130c   :  { %2773 = vmatprep.subr.mxu0 %v2936_v0  ;;  %2782 = vmatprep.subr.mxu1 %v2936_v0 }
0x130d   :  { %2774 = vmatpush3.msra.mxu0 %v3026_v33 }
0x130e   :  { %2775 = vmatprep.subr.mxu0 %v2936_v0 }
0x130f   :  { %2776 = vmatpush3.msra.mxu0 %v3032_v34 }
0x1310   :  { %2777 = vmatprep.subr.mxu0 %v2936_v0 }
0x1311   :  { %2778 = vmatpush3.msra.mxu0 %v3038_v35 }
0x13c1   :  { %v1896_v25 = vpop.f32.mrf.mxu0  ;;  %v1987_v26 = vpop.f32.mrf.mxu1 }
0x13c2   :  { %v1900_v27 = vadd.f32 %v1896_v25, %v1824_v24  ;;  %v1988_v37 = vadd.f32 %v1987_v26, %v3063_v42 }
0x13c3   :  { %v2737_v31 = vpop.f32.mrf.mxu0  ;;  %v2748_v36 = vpop.f32.mrf.mxu1 }
0x13c4   :  { %2854 = vtanh.f32 %v1900_v27 }
0x13c9   :  { %v2059_v38 = vpop.f32.mrf.mxu0 }
0x13ca   :  { %v2063_v39 = vadd.f32 %v2059_v38, %v1988_v37 }
0x13cb   :  { %v2759_v33 = vpop.f32.mrf.mxu0 }
0x13cc   :  { %2856 = vtanh.f32 %v2063_v39 }
0x13d1   :  { %v2855_v40 = vpop.eup %2854 }
0x13d2   :  { %1906 = vrot.lane.b32.xlu0 %v2855_v40, %s2938_s0  ;;  %v1902_v35 = vmul.f32 0.5, %v2855_v40 }
0x13d4   :  { %v1903_v41 = vadd.f32 0.5, %v1902_v35 }
0x13d6   :  { %v1904_v49 = vmul.f32 %v1903_v41, %v3325_v16  ;;  %v55_v16 = vld [vmem:[#allocation7 + $0x88] sm:$0xff] }
0x13d9   :  { %v2857_v34 = vpop.eup %2856 }
0x13da   :  { %2069 = vrot.lane.b32.xlu1 %v2857_v34, %s2938_s0  ;;  %v2065_v45 = vmul.f32 0.5, %v2857_v34 }
0x13dc   :  { %v2066_v46 = vadd.f32 0.5, %v2065_v45 }
0x13de   :  { %v2067_v52 = vmul.f32 %v2066_v46, %v3329_v19 }
0x1444   :  { %v1907_v43 = vpop.permute.xlu0 %1906 }
0x1445   :  { %v1909_v44 = vmul.f32 %v1907_v43, %v1903_v41 }
0x1447   :  { %1911 = vrot.lane.b32.xlu0 %v1909_v44, %s2939_s1 }
0x144c   :  { %v2070_v47 = vpop.permute.xlu1 %2069 }
0x144d   :  { %v2072_v48 = vmul.f32 %v2070_v47, %v2066_v46 }
0x144f   :  { %2074 = vrot.lane.b32.xlu1 %v2072_v48, %s2939_s1 }
0x14b9   :  { %v1912_v50 = vpop.permute.xlu0 %1911 }
0x14ba   :  { %v1914_v51 = vadd.f32 %v1912_v50, %v1904_v49 }
0x14bc   :  { %2858 = vtanh.f32 %v1914_v51 }
0x14c1   :  { %v2075_v53 = vpop.permute.xlu1 %2074 }
0x14c2   :  { %v2077_v54 = vadd.f32 %v2075_v53, %v2067_v52 }
0x14c4   :  { %2860 = vtanh.f32 %v2077_v54 }
0x14c9   :  { %v2859_v55 = vpop.eup %2858 }
0x14ca   :  { %1917 = vrot.lane.b32.xlu0 %v2859_v55, %s2938_s0 }
0x14d1   :  { %v2861_v56 = vpop.eup %2860 }
0x14d2   :  { %2080 = vrot.lane.b32.xlu1 %v2861_v56, %s2938_s0 }
0x153c   :  { %v1918_v4 = vpop.permute.xlu0 %1917 }
0x153d   :  { %v1920_v5 = vmul.f32 %v1918_v4, %v1903_v41 }
0x153f   :  { %2090 = vrot.lane.b32.xlu0 %v1920_v5, %s2939_s1 }
0x1544   :  { %v2081_v6 = vpop.permute.xlu1 %2080 }
0x1545   :  { %v2083_v7 = vmul.f32 %v2081_v6, %v2066_v46 }
0x1547   :  { %2085 = vrot.lane.b32.xlu1 %v2083_v7, %s2939_s1 }
0x15b1   :  { %v2091_v57 = vpop.permute.xlu0 %2090 }
0x15b2   :  { %2769 = vmatmul.mubr.msk.f32.vlgmr.msra.gmra.mxu1 %vm140_vm2, %v2091_v57 }
0x15b3   :  { %2790 = vmatprep.mubr.msk.f32.mxu1 %vm2937_vm0, %v2936_v0 }
0x15b9   :  { %v2086_v58 = vpop.permute.xlu1 %2085 }
0x15ba   :  { %2088 = vst.msk [vmem:[#allocation3 + $0x6] sm:$0x1] %vm497_vm3, %v2086_v58  ;;  %2780 = vmatmul.mubr.msk.f32.vlgmr.msra.gmra.mxu0 %vm140_vm2, %v2086_v58 }
0x1672   :  { %v2160_v59 = vpop.f32.mrf.mxu1 }
0x1673   :  { %v2161_v61 = vadd.f32 %v2160_v59, %v3063_v42  ;;  %v57_v42 = vld [vmem:[#allocation7 + $0x98] sm:$0xff] }
0x1674   :  { %v2770_v60 = vpop.f32.mrf.mxu1  ;;  %2783 = vmatpush3.msra.mxu1 %v57_v42 }
0x1675   :  { %2784 = vmatprep.subr.mxu1 %v2936_v0 }
0x1676   :  { %2785 = vmatpush3.msra.mxu1 %v56_v15 }
0x1677   :  { %2786 = vmatprep.subr.mxu1 %v2936_v0 }
0x1678   :  { %2787 = vmatpush3.msra.mxu1 %v55_v16 }
0x1679   :  { %2788 = vmatprep.subr.mxu1 %v2936_v0 }
0x167a   :  { %v2232_v62 = vpop.f32.mrf.mxu0  ;;  %2789 = vmatpush3.msra.mxu1 %v54_v17 }
0x167b   :  { %v2236_v63 = vadd.f32 %v2232_v62, %v2161_v61 }
0x167c   :  { %v2781_v1 = vpop.f32.mrf.mxu0 }
0x167d   :  { %2862 = vtanh.f32 %v2236_v63 }
0x168a   :  { %v2863_v2 = vpop.eup %2862 }
0x168b   :  { %2242 = vrot.lane.b32.xlu0 %v2863_v2, %s2938_s0  ;;  %v2238_v3 = vmul.f32 0.5, %v2863_v2 }
0x168d   :  { %v2239_v8 = vadd.f32 0.5, %v2238_v3 }
0x168f   :  { %v2240_v11 = vmul.f32 %v2239_v8, %v2077_v54 }
0x16fd   :  { %v2243_v9 = vpop.permute.xlu0 %2242 }
0x16fe   :  { %v2245_v10 = vmul.f32 %v2243_v9, %v2239_v8 }
0x1700   :  { %2247 = vrot.lane.b32.xlu1 %v2245_v10, %s2939_s1 }
0x1772   :  { %v2248_v12 = vpop.permute.xlu1 %2247 }
0x1773   :  { %v2250_v13 = vadd.f32 %v2248_v12, %v2240_v11 }
0x1775   :  { %2864 = vtanh.f32 %v2250_v13 }
0x1782   :  { %v2865_v14 = vpop.eup %2864 }
0x1783   :  { %2253 = vrot.lane.b32.xlu0 %v2865_v14, %s2938_s0 }
0x17f5   :  { %v2254_v18 = vpop.permute.xlu0 %2253 }
0x17f6   :  { %v2256_v19 = vmul.f32 %v2254_v18, %v2239_v8 }
0x17f8   :  { %2258 = vrot.lane.b32.xlu1 %v2256_v19, %s2939_s1 }
0x186a   :  { %v2259_v20 = vpop.permute.xlu1 %2258 }
0x186b   :  { %2261 = vst.msk [vmem:[#allocation3 + $0x7] sm:$0x1] %vm497_vm3, %v2259_v20 }
0x1872   :  { %v2262_v21 = vld [vmem:[#allocation3] sm:$0xff] }
0x1873   :  { %2791 = vmatmul.mubr.msk.f32.vlgmr.msra.gmra.mxu1 %vm140_vm2, %v2262_v21 }
0x1933   :  { %v2336_v23 = vpop.f32.mrf.mxu1 }
0x1934   :  { %v2337_v28 = vadd.f32 %v2381_v22, %v2336_v23 }
0x1935   :  { %v2792_v29 = vpop.f32.mrf.mxu1 }
0x1936   :  { %2340 = vst [vmem:[#allocation9] sm:$0xff] %v2337_v28 }
0x1937   :  { %2917 = shalt.err (!%p2914_p0)
}
0x1938   :  { %2350 = dma.vmem_to_hbm [thread:$0]  %s2348_s22, 128, %s3400_s2, [#allocation6]  }
0x1939   :  { %2930 = dma.done.wait [#allocation6], 128  }
0x193a   :  { %2931 = vsyncadd [#allocation6], 4294967168 }
0x193b   :  { %2354 = vsyncpa [#allocation5], 1 }
0x193c   :  { %2355 = vsyncpa [#allocation8], 1 }
0x193d   :  { %2356 = vsyncpa [#allocation6], 1 }

</bundles_post_ra>
